<compile_context>
chip_gen: v6e
topology: v6e:2x2x1
jax: 0.10.0
libtpu: 0.0.40
codegen_flags: <defaults>
</compile_context>

<pallas_src>
import functools

import jax
import jax.numpy as jnp
from jax import lax
from jax.experimental import pallas as pl
from jax.experimental.pallas import tpu as pltpu


# ---------------------------------------------------------------------------
# helpers
# ---------------------------------------------------------------------------
def _gelu(x):
    # exact (erf-based) GELU, matching torch.nn.GELU() default
    return 0.5 * x * (1.0 + lax.erf(x * 0.7071067811865476))


# ---------------------------------------------------------------------------
# fused DoubleConv kernel (one grid step per batch sample)
# ---------------------------------------------------------------------------
def _make_double_conv_kernel(H, W, Cin, Cmid, Cout, pad, *, residual, eps=1e-5):
    HW = H * W

    def conv3x3(buf_ref, w_ref, masks_ref, c_out):
        # 3x3 conv (padding=1) as 9 shifted (c_out, c_in) x (c_in, HW) matmuls.
        # The flat padded buffer makes every tap a contiguous lane slice; only
        # horizontal taps need masking (row-wraparound at w==0 / w==W-1).
        acc = jnp.zeros((c_out, HW), jnp.float32)
        for dh in range(3):
            for dw in range(3):
                off = (dh - 1) * W + (dw - 1)
                patch = buf_ref[:, pad + off:pad + off + HW]
                if dw == 0:
                    patch = patch * masks_ref[0:1, :]
                elif dw == 2:
                    patch = patch * masks_ref[1:2, :]
                acc = acc + jnp.dot(w_ref[dh, dw], patch,
                                    preferred_element_type=jnp.float32)
        return acc

    def groupnorm(z, g_ref, b_ref, c_out):
        # GroupNorm(1, C): single-pass statistics over all (C, H*W) of a sample.
        n = float(c_out * HW)
        s = jnp.sum(z)
        ss = jnp.sum(z * z)
        mean = s / n
        var = ss / n - mean * mean
        inv = lax.rsqrt(var + eps)
        scale = g_ref[...] * inv                 # (C, 1)
        shift = b_ref[...] - mean * scale        # (C, 1)
        return z * scale + shift                 # lane-broadcast

    def kernel(masks_ref, x_ref, w1_ref, g1_ref, b1_ref, w2_ref, g2_ref, b2_ref,
               out_ref, buf1_ref, buf2_ref):
        x = x_ref[0]                             # (Cin, HW)

        # ---- stage 1: conv3x3 -> GN -> GELU (stays entirely in VMEM) ----
        buf1_ref[...] = jnp.zeros_like(buf1_ref)
        buf1_ref[:, pad:pad + HW] = x
        h = conv3x3(buf1_ref, w1_ref, masks_ref, Cmid)
        h = _gelu(groupnorm(h, g1_ref, b1_ref, Cmid))

        # ---- stage 2: conv3x3 -> GN ----
        buf2_ref[...] = jnp.zeros_like(buf2_ref)
        buf2_ref[:, pad:pad + HW] = h
        y = conv3x3(buf2_ref, w2_ref, masks_ref, Cout)
        y = groupnorm(y, g2_ref, b2_ref, Cout)

        if residual:
            y = _gelu(x + y)                     # requires Cin == Cout

        out_ref[...] = y.reshape(1, Cout, HW).astype(out_ref.dtype)

    return kernel


def double_conv(x, params, *, residual=False):
    """x: (B, Cin, H, W) NCHW float32.  Returns (B, Cout, H, W)."""
    B, Cin, H, W = x.shape
    w1 = params["w1"]                            # (3, 3, Cmid, Cin)
    w2 = params["w2"]                            # (3, 3, Cout, Cmid)
    Cmid, Cout = w1.shape[2], w2.shape[2]
    if residual and Cin != Cout:
        raise ValueError("residual DoubleConv requires Cin == Cout")

    HW = H * W
    pad = -(-(W + 1) // 128) * 128               # lane-aligned halo for flat scratch

    # boundary masks for the horizontally-shifted taps (computed once, on host)
    ww = jnp.arange(HW, dtype=jnp.int32) % W
    masks = jnp.stack([(ww > 0), (ww < W - 1)]).astype(jnp.float32)   # (2, HW)

    x_flat = x.reshape(B, Cin, HW)               # channel-major, lane-dense
    g1 = params["g1"].reshape(Cmid, 1)
    b1 = params["b1"].reshape(Cmid, 1)
    g2 = params["g2"].reshape(Cout, 1)
    b2 = params["b2"].reshape(Cout, 1)

    kernel = _make_double_conv_kernel(H, W, Cin, Cmid, Cout, pad,
                                      residual=residual)

    flops = 2 * B * 9 * HW * (Cin * Cmid + Cmid * Cout) \
        + 10 * B * HW * (Cmid + 2 * Cout)
    transcendentals = B * HW * (Cmid + (Cout if residual else 0))
    bytes_accessed = 4 * (B * HW * (Cin + Cout)
                          + 9 * (Cin * Cmid + Cmid * Cout)
                          + 2 * (Cmid + Cout) + 2 * HW)

    out_flat = pl.pallas_call(
        kernel,
        out_shape=jax.ShapeDtypeStruct((B, Cout, HW), jnp.float32),
        grid=(B,),
        in_specs=[
            pl.BlockSpec((2, HW), lambda b: (0, 0)),                    # masks
            pl.BlockSpec((1, Cin, HW), lambda b: (b, 0, 0)),            # x
            pl.BlockSpec((3, 3, Cmid, Cin), lambda b: (0, 0, 0, 0)),    # w1
            pl.BlockSpec((Cmid, 1), lambda b: (0, 0)),                  # gamma1
            pl.BlockSpec((Cmid, 1), lambda b: (0, 0)),                  # beta1
            pl.BlockSpec((3, 3, Cout, Cmid), lambda b: (0, 0, 0, 0)),   # w2
            pl.BlockSpec((Cout, 1), lambda b: (0, 0)),                  # gamma2
            pl.BlockSpec((Cout, 1), lambda b: (0, 0)),                  # beta2
        ],
        out_specs=pl.BlockSpec((1, Cout, HW), lambda b: (b, 0, 0)),
        scratch_shapes=[
            pltpu.VMEM((Cin, HW + 2 * pad), jnp.float32),   # padded stage-1 input
            pltpu.VMEM((Cmid, HW + 2 * pad), jnp.float32),  # padded stage-2 input
        ],
        compiler_params=pltpu.CompilerParams(
            dimension_semantics=("parallel",)),
        cost_estimate=pl.CostEstimate(flops=flops,
                                      transcendentals=transcendentals,
                                      bytes_accessed=bytes_accessed),
    )(masks, x_flat, w1, g1, b1, w2, g2, b2)

    return out_flat.reshape(B, Cout, H, W)


# ---------------------------------------------------------------------------
# pure-JAX reference (for correctness check of the Pallas path)
# ---------------------------------------------------------------------------
def double_conv_ref(x, params, *, residual=False):
    def conv(z, wt):                             # wt: (3, 3, Cout, Cin)
        w_hwio = jnp.transpose(wt, (0, 1, 3, 2))
        return lax.conv_general_dilated(z, w_hwio, (1, 1), "SAME",
                                        dimension_numbers=("NCHW", "HWIO", "NCHW"))

    def gn(z, g, b, eps=1e-5):
        m = z.mean(axis=(1, 2, 3), keepdims=True)
        v = ((z - m) ** 2).mean(axis=(1, 2, 3), keepdims=True)
        return (z - m) * lax.rsqrt(v + eps) * g.reshape(1, -1, 1, 1) \
            + b.reshape(1, -1, 1, 1)

    h = _gelu(gn(conv(x, params["w1"]), params["g1"], params["b1"]))
    h = gn(conv(h, params["w2"]), params["g2"], params["b2"])
    return _gelu(x + h) if residual else h


# ---------------------------------------------------------------------------
if __name__ == "__main__":
    key = jax.random.PRNGKey(0)
    B, C, H, W = 2, 4, 16, 16

    def make_params(k, cin, cmid, cout):
        ks = jax.random.split(k, 6)
        return {
            "w1": 0.1 * jax.random.normal(ks[0], (3, 3, cmid, cin), jnp.float32),
            "g1": 1.0 + 0.1 * jax.random.normal(ks[1], (cmid,), jnp.float32),
            "b1": 0.1 * jax.random.normal(ks[2], (cmid,), jnp.float32),
            "w2": 0.1 * jax.random.normal(ks[3], (3, 3, cout, cmid), jnp.float32),
            "g2": 1.0 + 0.1 * jax.random.normal(ks[4], (cout,), jnp.float32),
            "b2": 0.1 * jax.random.normal(ks[5], (cout,), jnp.float32),
        }

    kx, k1, k2 = jax.random.split(key, 3)
    x = jax.random.normal(kx, (B, C, H, W), jnp.float32)

    # config 1: DoubleConv(C, C, residual=True)   (mid defaults to out = C)
    p_res = make_params(k1, C, C, C)
    # config 2: DoubleConv(C, 2C)                 (mid defaults to out = 2C)
    p_plain = make_params(k2, C, 2 * C, 2 * C)

    f_res = jax.jit(functools.partial(double_conv, residual=True))
    f_plain = jax.jit(functools.partial(double_conv, residual=False))

    out_res = jax.block_until_ready(f_res(x, p_res))
    out_plain = jax.block_until_ready(f_plain(x, p_plain))

    ref_res = double_conv_ref(x, p_res, residual=True)
    ref_plain = double_conv_ref(x, p_plain, residual=False)

    assert out_res.shape == (B, C, H, W), out_res.shape
    assert out_plain.shape == (B, 2 * C, H, W), out_plain.shape
    if not jnp.allclose(out_res, ref_res, rtol=2e-2, atol=2e-2):
        raise RuntimeError("residual DoubleConv mismatch vs JAX reference")
    if not jnp.allclose(out_plain, ref_plain, rtol=2e-2, atol=2e-2):
        raise RuntimeError("plain DoubleConv mismatch vs JAX reference")

    print("KERNEL_OK")
</pallas_src>

<mosaic_0001>
module attributes {stable_mosaic.version = 11 : i64} {
  func.func @kernel(%arg0: i32, %arg1: memref<2x256xf32, #tpu.memory_space<vmem>>, %arg2: memref<1x4x256xf32, #tpu.memory_space<vmem>>, %arg3: memref<3x3x4x4xf32, #tpu.memory_space<vmem>>, %arg4: memref<4x1xf32, #tpu.memory_space<vmem>>, %arg5: memref<4x1xf32, #tpu.memory_space<vmem>>, %arg6: memref<3x3x4x4xf32, #tpu.memory_space<vmem>>, %arg7: memref<4x1xf32, #tpu.memory_space<vmem>>, %arg8: memref<4x1xf32, #tpu.memory_space<vmem>>, %arg9: memref<1x4x256xf32, #tpu.memory_space<vmem>>, %arg10: memref<4x512xf32, #tpu.memory_space<vmem>>, %arg11: memref<4x512xf32, #tpu.memory_space<vmem>>) attributes {dimension_semantics = [#tpu.dimension_semantics<parallel>], iteration_bounds = array<i64: 2>, scalar_prefetch = 0 : i64, scratch_operands = 2 : i64, tpu.core_type = #tpu.core_type<tc>, window_params = [{pipeline_mode = #tpu.pipeline_mode<synchronous>, transform_indices = @transform_0, window_bounds = array<i64: 2, 256>}, {transform_indices = @transform_1, window_bounds = array<i64: 1, 4, 256>}, {pipeline_mode = #tpu.pipeline_mode<synchronous>, transform_indices = @transform_2, window_bounds = array<i64: 3, 3, 4, 4>}, {pipeline_mode = #tpu.pipeline_mode<synchronous>, transform_indices = @transform_3, window_bounds = array<i64: 4, 1>}, {pipeline_mode = #tpu.pipeline_mode<synchronous>, transform_indices = @transform_4, window_bounds = array<i64: 4, 1>}, {pipeline_mode = #tpu.pipeline_mode<synchronous>, transform_indices = @transform_5, window_bounds = array<i64: 3, 3, 4, 4>}, {pipeline_mode = #tpu.pipeline_mode<synchronous>, transform_indices = @transform_6, window_bounds = array<i64: 4, 1>}, {pipeline_mode = #tpu.pipeline_mode<synchronous>, transform_indices = @transform_7, window_bounds = array<i64: 4, 1>}, {transform_indices = @transform_8, window_bounds = array<i64: 1, 4, 256>}]} {
    %c0 = arith.constant 0 : index
    %c0_0 = arith.constant 0 : index
    %c0_1 = arith.constant 0 : index
    %0 = vector.load %arg2[%c0, %c0_0, %c0_1] : memref<1x4x256xf32, #tpu.memory_space<vmem>>, vector<1x4x256xf32>
    %1 = vector.shape_cast %0 : vector<1x4x256xf32> to vector<4x256xf32>
    %cst = arith.constant 0.000000e+00 : f32
    %2 = vector.broadcast %cst : f32 to vector<4x512xf32>
    %c0_2 = arith.constant 0 : index
    %c0_3 = arith.constant 0 : index
    %3 = vector.load %arg10[%c0_2, %c0_3] : memref<4x512xf32, #tpu.memory_space<vmem>>, vector<4x512xf32>
    tpu.vector_store %arg10[%c0_2, %c0_3], %2 {strides = array<i32>} : memref<4x512xf32, #tpu.memory_space<vmem>>, vector<4x512xf32>,
    %c0_4 = arith.constant 0 : index
    %c128 = arith.constant 128 : index
    %4 = vector.load %arg10[%c0_4, %c128] : memref<4x512xf32, #tpu.memory_space<vmem>>, vector<4x256xf32>
    tpu.vector_store %arg10[%c0_4, %c128], %1 {strides = array<i32>} : memref<4x512xf32, #tpu.memory_space<vmem>>, vector<4x256xf32>,
    %cst_5 = arith.constant 0.000000e+00 : f32
    %5 = vector.broadcast %cst_5 : f32 to vector<4x256xf32>
    %c0_6 = arith.constant 0 : index
    %c111 = arith.constant 111 : index
    %6 = vector.load %arg10[%c0_6, %c111] : memref<4x512xf32, #tpu.memory_space<vmem>>, vector<4x256xf32>
    %c0_7 = arith.constant 0 : index
    %c0_8 = arith.constant 0 : index
    %7 = vector.load %arg1[%c0_7, %c0_8] : memref<2x256xf32, #tpu.memory_space<vmem>>, vector<1x256xf32>
    %8 = vector.broadcast %7 : vector<1x256xf32> to vector<4x256xf32>
    %9 = arith.mulf %6, %8 : vector<4x256xf32>
    %c0_9 = arith.constant 0 : index
    %c0_10 = arith.constant 0 : index
    %c0_11 = arith.constant 0 : index
    %c0_12 = arith.constant 0 : index
    %10 = vector.load %arg3[%c0_9, %c0_10, %c0_11, %c0_12] : memref<3x3x4x4xf32, #tpu.memory_space<vmem>>, vector<1x1x4x4xf32>
    %11 = vector.shape_cast %10 : vector<1x1x4x4xf32> to vector<4x4xf32>
    %cst_13 = arith.constant dense<0.000000e+00> : vector<4x256xf32>
    %12 = tpu.matmul %11, %9, %cst_13 {dimension_numbers = #tpu.dot_dimension_numbers<[1], [0], [0], [1], [0, 0, 1, 1], [], []>} : vector<4x4xf32>, vector<4x256xf32>, vector<4x256xf32> -> vector<4x256xf32>
    %13 = arith.addf %5, %12 : vector<4x256xf32>
    %c0_14 = arith.constant 0 : index
    %c112 = arith.constant 112 : index
    %14 = vector.load %arg10[%c0_14, %c112] : memref<4x512xf32, #tpu.memory_space<vmem>>, vector<4x256xf32>
    %c0_15 = arith.constant 0 : index
    %c1 = arith.constant 1 : index
    %c0_16 = arith.constant 0 : index
    %c0_17 = arith.constant 0 : index
    %15 = vector.load %arg3[%c0_15, %c1, %c0_16, %c0_17] : memref<3x3x4x4xf32, #tpu.memory_space<vmem>>, vector<1x1x4x4xf32>
    %16 = vector.shape_cast %15 : vector<1x1x4x4xf32> to vector<4x4xf32>
    %cst_18 = arith.constant dense<0.000000e+00> : vector<4x256xf32>
    %17 = tpu.matmul %16, %14, %cst_18 {dimension_numbers = #tpu.dot_dimension_numbers<[1], [0], [0], [1], [0, 0, 1, 1], [], []>} : vector<4x4xf32>, vector<4x256xf32>, vector<4x256xf32> -> vector<4x256xf32>
    %18 = arith.addf %13, %17 : vector<4x256xf32>
    %c0_19 = arith.constant 0 : index
    %c113 = arith.constant 113 : index
    %19 = vector.load %arg10[%c0_19, %c113] : memref<4x512xf32, #tpu.memory_space<vmem>>, vector<4x256xf32>
    %c1_20 = arith.constant 1 : index
    %c0_21 = arith.constant 0 : index
    %20 = vector.load %arg1[%c1_20, %c0_21] : memref<2x256xf32, #tpu.memory_space<vmem>>, vector<1x256xf32>
    %21 = vector.broadcast %20 : vector<1x256xf32> to vector<4x256xf32>
    %22 = arith.mulf %19, %21 : vector<4x256xf32>
    %c0_22 = arith.constant 0 : index
    %c2 = arith.constant 2 : index
    %c0_23 = arith.constant 0 : index
    %c0_24 = arith.constant 0 : index
    %23 = vector.load %arg3[%c0_22, %c2, %c0_23, %c0_24] : memref<3x3x4x4xf32, #tpu.memory_space<vmem>>, vector<1x1x4x4xf32>
    %24 = vector.shape_cast %23 : vector<1x1x4x4xf32> to vector<4x4xf32>
    %cst_25 = arith.constant dense<0.000000e+00> : vector<4x256xf32>
    %25 = tpu.matmul %24, %22, %cst_25 {dimension_numbers = #tpu.dot_dimension_numbers<[1], [0], [0], [1], [0, 0, 1, 1], [], []>} : vector<4x4xf32>, vector<4x256xf32>, vector<4x256xf32> -> vector<4x256xf32>
    %26 = arith.addf %18, %25 : vector<4x256xf32>
    %c0_26 = arith.constant 0 : index
    %c127 = arith.constant 127 : index
    %27 = vector.load %arg10[%c0_26, %c127] : memref<4x512xf32, #tpu.memory_space<vmem>>, vector<4x256xf32>
    %c0_27 = arith.constant 0 : index
    %c0_28 = arith.constant 0 : index
    %28 = vector.load %arg1[%c0_27, %c0_28] : memref<2x256xf32, #tpu.memory_space<vmem>>, vector<1x256xf32>
    %29 = vector.broadcast %28 : vector<1x256xf32> to vector<4x256xf32>
    %30 = arith.mulf %27, %29 : vector<4x256xf32>
    %c1_29 = arith.constant 1 : index
    %c0_30 = arith.constant 0 : index
    %c0_31 = arith.constant 0 : index
    %c0_32 = arith.constant 0 : index
    %31 = vector.load %arg3[%c1_29, %c0_30, %c0_31, %c0_32] : memref<3x3x4x4xf32, #tpu.memory_space<vmem>>, vector<1x1x4x4xf32>
    %32 = vector.shape_cast %31 : vector<1x1x4x4xf32> to vector<4x4xf32>
    %cst_33 = arith.constant dense<0.000000e+00> : vector<4x256xf32>
    %33 = tpu.matmul %32, %30, %cst_33 {dimension_numbers = #tpu.dot_dimension_numbers<[1], [0], [0], [1], [0, 0, 1, 1], [], []>} : vector<4x4xf32>, vector<4x256xf32>, vector<4x256xf32> -> vector<4x256xf32>
    %34 = arith.addf %26, %33 : vector<4x256xf32>
    %c0_34 = arith.constant 0 : index
    %c128_35 = arith.constant 128 : index
    %35 = vector.load %arg10[%c0_34, %c128_35] : memref<4x512xf32, #tpu.memory_space<vmem>>, vector<4x256xf32>
    %c1_36 = arith.constant 1 : index
    %c1_37 = arith.constant 1 : index
    %c0_38 = arith.constant 0 : index
    %c0_39 = arith.constant 0 : index
    %36 = vector.load %arg3[%c1_36, %c1_37, %c0_38, %c0_39] : memref<3x3x4x4xf32, #tpu.memory_space<vmem>>, vector<1x1x4x4xf32>
    %37 = vector.shape_cast %36 : vector<1x1x4x4xf32> to vector<4x4xf32>
    %cst_40 = arith.constant dense<0.000000e+00> : vector<4x256xf32>
    %38 = tpu.matmul %37, %35, %cst_40 {dimension_numbers = #tpu.dot_dimension_numbers<[1], [0], [0], [1], [0, 0, 1, 1], [], []>} : vector<4x4xf32>, vector<4x256xf32>, vector<4x256xf32> -> vector<4x256xf32>
    %39 = arith.addf %34, %38 : vector<4x256xf32>
    %c0_41 = arith.constant 0 : index
    %c129 = arith.constant 129 : index
    %40 = vector.load %arg10[%c0_41, %c129] : memref<4x512xf32, #tpu.memory_space<vmem>>, vector<4x256xf32>
    %c1_42 = arith.constant 1 : index
    %c0_43 = arith.constant 0 : index
    %41 = vector.load %arg1[%c1_42, %c0_43] : memref<2x256xf32, #tpu.memory_space<vmem>>, vector<1x256xf32>
    %42 = vector.broadcast %41 : vector<1x256xf32> to vector<4x256xf32>
    %43 = arith.mulf %40, %42 : vector<4x256xf32>
    %c1_44 = arith.constant 1 : index
    %c2_45 = arith.constant 2 : index
    %c0_46 = arith.constant 0 : index
    %c0_47 = arith.constant 0 : index
    %44 = vector.load %arg3[%c1_44, %c2_45, %c0_46, %c0_47] : memref<3x3x4x4xf32, #tpu.memory_space<vmem>>, vector<1x1x4x4xf32>
    %45 = vector.shape_cast %44 : vector<1x1x4x4xf32> to vector<4x4xf32>
    %cst_48 = arith.constant dense<0.000000e+00> : vector<4x256xf32>
    %46 = tpu.matmul %45, %43, %cst_48 {dimension_numbers = #tpu.dot_dimension_numbers<[1], [0], [0], [1], [0, 0, 1, 1], [], []>} : vector<4x4xf32>, vector<4x256xf32>, vector<4x256xf32> -> vector<4x256xf32>
    %47 = arith.addf %39, %46 : vector<4x256xf32>
    %c0_49 = arith.constant 0 : index
    %c143 = arith.constant 143 : index
    %48 = vector.load %arg10[%c0_49, %c143] : memref<4x512xf32, #tpu.memory_space<vmem>>, vector<4x256xf32>
    %c0_50 = arith.constant 0 : index
    %c0_51 = arith.constant 0 : index
    %49 = vector.load %arg1[%c0_50, %c0_51] : memref<2x256xf32, #tpu.memory_space<vmem>>, vector<1x256xf32>
    %50 = vector.broadcast %49 : vector<1x256xf32> to vector<4x256xf32>
    %51 = arith.mulf %48, %50 : vector<4x256xf32>
    %c2_52 = arith.constant 2 : index
    %c0_53 = arith.constant 0 : index
    %c0_54 = arith.constant 0 : index
    %c0_55 = arith.constant 0 : index
    %52 = vector.load %arg3[%c2_52, %c0_53, %c0_54, %c0_55] : memref<3x3x4x4xf32, #tpu.memory_space<vmem>>, vector<1x1x4x4xf32>
    %53 = vector.shape_cast %52 : vector<1x1x4x4xf32> to vector<4x4xf32>
    %cst_56 = arith.constant dense<0.000000e+00> : vector<4x256xf32>
    %54 = tpu.matmul %53, %51, %cst_56 {dimension_numbers = #tpu.dot_dimension_numbers<[1], [0], [0], [1], [0, 0, 1, 1], [], []>} : vector<4x4xf32>, vector<4x256xf32>, vector<4x256xf32> -> vector<4x256xf32>
    %55 = arith.addf %47, %54 : vector<4x256xf32>
    %c0_57 = arith.constant 0 : index
    %c144 = arith.constant 144 : index
    %56 = vector.load %arg10[%c0_57, %c144] : memref<4x512xf32, #tpu.memory_space<vmem>>, vector<4x256xf32>
    %c2_58 = arith.constant 2 : index
    %c1_59 = arith.constant 1 : index
    %c0_60 = arith.constant 0 : index
    %c0_61 = arith.constant 0 : index
    %57 = vector.load %arg3[%c2_58, %c1_59, %c0_60, %c0_61] : memref<3x3x4x4xf32, #tpu.memory_space<vmem>>, vector<1x1x4x4xf32>
    %58 = vector.shape_cast %57 : vector<1x1x4x4xf32> to vector<4x4xf32>
    %cst_62 = arith.constant dense<0.000000e+00> : vector<4x256xf32>
    %59 = tpu.matmul %58, %56, %cst_62 {dimension_numbers = #tpu.dot_dimension_numbers<[1], [0], [0], [1], [0, 0, 1, 1], [], []>} : vector<4x4xf32>, vector<4x256xf32>, vector<4x256xf32> -> vector<4x256xf32>
    %60 = arith.addf %55, %59 : vector<4x256xf32>
    %c0_63 = arith.constant 0 : index
    %c145 = arith.constant 145 : index
    %61 = vector.load %arg10[%c0_63, %c145] : memref<4x512xf32, #tpu.memory_space<vmem>>, vector<4x256xf32>
    %c1_64 = arith.constant 1 : index
    %c0_65 = arith.constant 0 : index
    %62 = vector.load %arg1[%c1_64, %c0_65] : memref<2x256xf32, #tpu.memory_space<vmem>>, vector<1x256xf32>
    %63 = vector.broadcast %62 : vector<1x256xf32> to vector<4x256xf32>
    %64 = arith.mulf %61, %63 : vector<4x256xf32>
    %c2_66 = arith.constant 2 : index
    %c2_67 = arith.constant 2 : index
    %c0_68 = arith.constant 0 : index
    %c0_69 = arith.constant 0 : index
    %65 = vector.load %arg3[%c2_66, %c2_67, %c0_68, %c0_69] : memref<3x3x4x4xf32, #tpu.memory_space<vmem>>, vector<1x1x4x4xf32>
    %66 = vector.shape_cast %65 : vector<1x1x4x4xf32> to vector<4x4xf32>
    %cst_70 = arith.constant dense<0.000000e+00> : vector<4x256xf32>
    %67 = tpu.matmul %66, %64, %cst_70 {dimension_numbers = #tpu.dot_dimension_numbers<[1], [0], [0], [1], [0, 0, 1, 1], [], []>} : vector<4x4xf32>, vector<4x256xf32>, vector<4x256xf32> -> vector<4x256xf32>
    %68 = arith.addf %60, %67 : vector<4x256xf32>
    %69 = vector.shape_cast %68 : vector<4x256xf32> to vector<1x4x256xf32>
    %cst_71 = arith.constant dense<0.000000e+00> : vector<1xf32>
    %70 = vector.multi_reduction <add>, %69, %cst_71 [1, 2] : vector<1x4x256xf32> to vector<1xf32>
    %71 = vector.shape_cast %70 : vector<1xf32> to vector<1x1x1xf32>
    %72 = vector.extract %71[0, 0, 0] : f32 from vector<1x1x1xf32>
    %73 = arith.mulf %68, %68 : vector<4x256xf32>
    %74 = vector.shape_cast %73 : vector<4x256xf32> to vector<1x4x256xf32>
    %cst_72 = arith.constant dense<0.000000e+00> : vector<1xf32>
    %75 = vector.multi_reduction <add>, %74, %cst_72 [1, 2] : vector<1x4x256xf32> to vector<1xf32>
    %76 = vector.shape_cast %75 : vector<1xf32> to vector<1x1x1xf32>
    %77 = vector.extract %76[0, 0, 0] : f32 from vector<1x1x1xf32>
    %cst_73 = arith.constant 1.024000e+03 : f32
    %78 = arith.divf %72, %cst_73 : f32
    %cst_74 = arith.constant 1.024000e+03 : f32
    %79 = arith.divf %77, %cst_74 : f32
    %80 = arith.mulf %78, %78 : f32
    %81 = arith.subf %79, %80 : f32
    %cst_75 = arith.constant 9.99999974E-6 : f32
    %82 = arith.addf %81, %cst_75 : f32
    %83 = math.rsqrt %82 : f32
    %c0_76 = arith.constant 0 : index
    %c0_77 = arith.constant 0 : index
    %84 = vector.load %arg4[%c0_76, %c0_77] : memref<4x1xf32, #tpu.memory_space<vmem>>, vector<4x1xf32>
    %85 = vector.broadcast %83 : f32 to vector<4x1xf32>
    %86 = arith.mulf %84, %85 : vector<4x1xf32>
    %c0_78 = arith.constant 0 : index
    %c0_79 = arith.constant 0 : index
    %87 = vector.load %arg5[%c0_78, %c0_79] : memref<4x1xf32, #tpu.memory_space<vmem>>, vector<4x1xf32>
    %88 = vector.broadcast %78 : f32 to vector<4x1xf32>
    %89 = arith.mulf %88, %86 : vector<4x1xf32>
    %90 = arith.subf %87, %89 : vector<4x1xf32>
    %91 = vector.broadcast %86 : vector<4x1xf32> to vector<4x256xf32>
    %92 = arith.mulf %68, %91 : vector<4x256xf32>
    %93 = vector.broadcast %90 : vector<4x1xf32> to vector<4x256xf32>
    %94 = arith.addf %92, %93 : vector<4x256xf32>
    %cst_80 = arith.constant 5.000000e-01 : f32
    %95 = vector.broadcast %cst_80 : f32 to vector<4x256xf32>
    %96 = arith.mulf %95, %94 : vector<4x256xf32>
    %cst_81 = arith.constant 0.707106769 : f32
    %97 = vector.broadcast %cst_81 : f32 to vector<4x256xf32>
    %98 = arith.mulf %94, %97 : vector<4x256xf32>
    %99 = math.erf %98 : vector<4x256xf32>
    %cst_82 = arith.constant 1.000000e+00 : f32
    %100 = vector.broadcast %cst_82 : f32 to vector<4x256xf32>
    %101 = arith.addf %100, %99 : vector<4x256xf32>
    %102 = arith.mulf %96, %101 : vector<4x256xf32>
    %cst_83 = arith.constant 0.000000e+00 : f32
    %103 = vector.broadcast %cst_83 : f32 to vector<4x512xf32>
    %c0_84 = arith.constant 0 : index
    %c0_85 = arith.constant 0 : index
    %104 = vector.load %arg11[%c0_84, %c0_85] : memref<4x512xf32, #tpu.memory_space<vmem>>, vector<4x512xf32>
    tpu.vector_store %arg11[%c0_84, %c0_85], %103 {strides = array<i32>} : memref<4x512xf32, #tpu.memory_space<vmem>>, vector<4x512xf32>,
    %c0_86 = arith.constant 0 : index
    %c128_87 = arith.constant 128 : index
    %105 = vector.load %arg11[%c0_86, %c128_87] : memref<4x512xf32, #tpu.memory_space<vmem>>, vector<4x256xf32>
    tpu.vector_store %arg11[%c0_86, %c128_87], %102 {strides = array<i32>} : memref<4x512xf32, #tpu.memory_space<vmem>>, vector<4x256xf32>,
    %cst_88 = arith.constant 0.000000e+00 : f32
    %106 = vector.broadcast %cst_88 : f32 to vector<4x256xf32>
    %c0_89 = arith.constant 0 : index
    %c111_90 = arith.constant 111 : index
    %107 = vector.load %arg11[%c0_89, %c111_90] : memref<4x512xf32, #tpu.memory_space<vmem>>, vector<4x256xf32>
    %c0_91 = arith.constant 0 : index
    %c0_92 = arith.constant 0 : index
    %108 = vector.load %arg1[%c0_91, %c0_92] : memref<2x256xf32, #tpu.memory_space<vmem>>, vector<1x256xf32>
    %109 = vector.broadcast %108 : vector<1x256xf32> to vector<4x256xf32>
    %110 = arith.mulf %107, %109 : vector<4x256xf32>
    %c0_93 = arith.constant 0 : index
    %c0_94 = arith.constant 0 : index
    %c0_95 = arith.constant 0 : index
    %c0_96 = arith.constant 0 : index
    %111 = vector.load %arg6[%c0_93, %c0_94, %c0_95, %c0_96] : memref<3x3x4x4xf32, #tpu.memory_space<vmem>>, vector<1x1x4x4xf32>
    %112 = vector.shape_cast %111 : vector<1x1x4x4xf32> to vector<4x4xf32>
    %cst_97 = arith.constant dense<0.000000e+00> : vector<4x256xf32>
    %113 = tpu.matmul %112, %110, %cst_97 {dimension_numbers = #tpu.dot_dimension_numbers<[1], [0], [0], [1], [0, 0, 1, 1], [], []>} : vector<4x4xf32>, vector<4x256xf32>, vector<4x256xf32> -> vector<4x256xf32>
    %114 = arith.addf %106, %113 : vector<4x256xf32>
    %c0_98 = arith.constant 0 : index
    %c112_99 = arith.constant 112 : index
    %115 = vector.load %arg11[%c0_98, %c112_99] : memref<4x512xf32, #tpu.memory_space<vmem>>, vector<4x256xf32>
    %c0_100 = arith.constant 0 : index
    %c1_101 = arith.constant 1 : index
    %c0_102 = arith.constant 0 : index
    %c0_103 = arith.constant 0 : index
    %116 = vector.load %arg6[%c0_100, %c1_101, %c0_102, %c0_103] : memref<3x3x4x4xf32, #tpu.memory_space<vmem>>, vector<1x1x4x4xf32>
    %117 = vector.shape_cast %116 : vector<1x1x4x4xf32> to vector<4x4xf32>
    %cst_104 = arith.constant dense<0.000000e+00> : vector<4x256xf32>
    %118 = tpu.matmul %117, %115, %cst_104 {dimension_numbers = #tpu.dot_dimension_numbers<[1], [0], [0], [1], [0, 0, 1, 1], [], []>} : vector<4x4xf32>, vector<4x256xf32>, vector<4x256xf32> -> vector<4x256xf32>
    %119 = arith.addf %114, %118 : vector<4x256xf32>
    %c0_105 = arith.constant 0 : index
    %c113_106 = arith.constant 113 : index
    %120 = vector.load %arg11[%c0_105, %c113_106] : memref<4x512xf32, #tpu.memory_space<vmem>>, vector<4x256xf32>
    %c1_107 = arith.constant 1 : index
    %c0_108 = arith.constant 0 : index
    %121 = vector.load %arg1[%c1_107, %c0_108] : memref<2x256xf32, #tpu.memory_space<vmem>>, vector<1x256xf32>
    %122 = vector.broadcast %121 : vector<1x256xf32> to vector<4x256xf32>
    %123 = arith.mulf %120, %122 : vector<4x256xf32>
    %c0_109 = arith.constant 0 : index
    %c2_110 = arith.constant 2 : index
    %c0_111 = arith.constant 0 : index
    %c0_112 = arith.constant 0 : index
    %124 = vector.load %arg6[%c0_109, %c2_110, %c0_111, %c0_112] : memref<3x3x4x4xf32, #tpu.memory_space<vmem>>, vector<1x1x4x4xf32>
    %125 = vector.shape_cast %124 : vector<1x1x4x4xf32> to vector<4x4xf32>
    %cst_113 = arith.constant dense<0.000000e+00> : vector<4x256xf32>
    %126 = tpu.matmul %125, %123, %cst_113 {dimension_numbers = #tpu.dot_dimension_numbers<[1], [0], [0], [1], [0, 0, 1, 1], [], []>} : vector<4x4xf32>, vector<4x256xf32>, vector<4x256xf32> -> vector<4x256xf32>
    %127 = arith.addf %119, %126 : vector<4x256xf32>
    %c0_114 = arith.constant 0 : index
    %c127_115 = arith.constant 127 : index
    %128 = vector.load %arg11[%c0_114, %c127_115] : memref<4x512xf32, #tpu.memory_space<vmem>>, vector<4x256xf32>
    %c0_116 = arith.constant 0 : index
    %c0_117 = arith.constant 0 : index
    %129 = vector.load %arg1[%c0_116, %c0_117] : memref<2x256xf32, #tpu.memory_space<vmem>>, vector<1x256xf32>
    %130 = vector.broadcast %129 : vector<1x256xf32> to vector<4x256xf32>
    %131 = arith.mulf %128, %130 : vector<4x256xf32>
    %c1_118 = arith.constant 1 : index
    %c0_119 = arith.constant 0 : index
    %c0_120 = arith.constant 0 : index
    %c0_121 = arith.constant 0 : index
    %132 = vector.load %arg6[%c1_118, %c0_119, %c0_120, %c0_121] : memref<3x3x4x4xf32, #tpu.memory_space<vmem>>, vector<1x1x4x4xf32>
    %133 = vector.shape_cast %132 : vector<1x1x4x4xf32> to vector<4x4xf32>
    %cst_122 = arith.constant dense<0.000000e+00> : vector<4x256xf32>
    %134 = tpu.matmul %133, %131, %cst_122 {dimension_numbers = #tpu.dot_dimension_numbers<[1], [0], [0], [1], [0, 0, 1, 1], [], []>} : vector<4x4xf32>, vector<4x256xf32>, vector<4x256xf32> -> vector<4x256xf32>
    %135 = arith.addf %127, %134 : vector<4x256xf32>
    %c0_123 = arith.constant 0 : index
    %c128_124 = arith.constant 128 : index
    %136 = vector.load %arg11[%c0_123, %c128_124] : memref<4x512xf32, #tpu.memory_space<vmem>>, vector<4x256xf32>
    %c1_125 = arith.constant 1 : index
    %c1_126 = arith.constant 1 : index
    %c0_127 = arith.constant 0 : index
    %c0_128 = arith.constant 0 : index
    %137 = vector.load %arg6[%c1_125, %c1_126, %c0_127, %c0_128] : memref<3x3x4x4xf32, #tpu.memory_space<vmem>>, vector<1x1x4x4xf32>
    %138 = vector.shape_cast %137 : vector<1x1x4x4xf32> to vector<4x4xf32>
    %cst_129 = arith.constant dense<0.000000e+00> : vector<4x256xf32>
    %139 = tpu.matmul %138, %136, %cst_129 {dimension_numbers = #tpu.dot_dimension_numbers<[1], [0], [0], [1], [0, 0, 1, 1], [], []>} : vector<4x4xf32>, vector<4x256xf32>, vector<4x256xf32> -> vector<4x256xf32>
    %140 = arith.addf %135, %139 : vector<4x256xf32>
    %c0_130 = arith.constant 0 : index
    %c129_131 = arith.constant 129 : index
    %141 = vector.load %arg11[%c0_130, %c129_131] : memref<4x512xf32, #tpu.memory_space<vmem>>, vector<4x256xf32>
    %c1_132 = arith.constant 1 : index
    %c0_133 = arith.constant 0 : index
    %142 = vector.load %arg1[%c1_132, %c0_133] : memref<2x256xf32, #tpu.memory_space<vmem>>, vector<1x256xf32>
    %143 = vector.broadcast %142 : vector<1x256xf32> to vector<4x256xf32>
    %144 = arith.mulf %141, %143 : vector<4x256xf32>
    %c1_134 = arith.constant 1 : index
    %c2_135 = arith.constant 2 : index
    %c0_136 = arith.constant 0 : index
    %c0_137 = arith.constant 0 : index
    %145 = vector.load %arg6[%c1_134, %c2_135, %c0_136, %c0_137] : memref<3x3x4x4xf32, #tpu.memory_space<vmem>>, vector<1x1x4x4xf32>
    %146 = vector.shape_cast %145 : vector<1x1x4x4xf32> to vector<4x4xf32>
    %cst_138 = arith.constant dense<0.000000e+00> : vector<4x256xf32>
    %147 = tpu.matmul %146, %144, %cst_138 {dimension_numbers = #tpu.dot_dimension_numbers<[1], [0], [0], [1], [0, 0, 1, 1], [], []>} : vector<4x4xf32>, vector<4x256xf32>, vector<4x256xf32> -> vector<4x256xf32>
    %148 = arith.addf %140, %147 : vector<4x256xf32>
    %c0_139 = arith.constant 0 : index
    %c143_140 = arith.constant 143 : index
    %149 = vector.load %arg11[%c0_139, %c143_140] : memref<4x512xf32, #tpu.memory_space<vmem>>, vector<4x256xf32>
    %c0_141 = arith.constant 0 : index
    %c0_142 = arith.constant 0 : index
    %150 = vector.load %arg1[%c0_141, %c0_142] : memref<2x256xf32, #tpu.memory_space<vmem>>, vector<1x256xf32>
    %151 = vector.broadcast %150 : vector<1x256xf32> to vector<4x256xf32>
    %152 = arith.mulf %149, %151 : vector<4x256xf32>
    %c2_143 = arith.constant 2 : index
    %c0_144 = arith.constant 0 : index
    %c0_145 = arith.constant 0 : index
    %c0_146 = arith.constant 0 : index
    %153 = vector.load %arg6[%c2_143, %c0_144, %c0_145, %c0_146] : memref<3x3x4x4xf32, #tpu.memory_space<vmem>>, vector<1x1x4x4xf32>
    %154 = vector.shape_cast %153 : vector<1x1x4x4xf32> to vector<4x4xf32>
    %cst_147 = arith.constant dense<0.000000e+00> : vector<4x256xf32>
    %155 = tpu.matmul %154, %152, %cst_147 {dimension_numbers = #tpu.dot_dimension_numbers<[1], [0], [0], [1], [0, 0, 1, 1], [], []>} : vector<4x4xf32>, vector<4x256xf32>, vector<4x256xf32> -> vector<4x256xf32>
    %156 = arith.addf %148, %155 : vector<4x256xf32>
    %c0_148 = arith.constant 0 : index
    %c144_149 = arith.constant 144 : index
    %157 = vector.load %arg11[%c0_148, %c144_149] : memref<4x512xf32, #tpu.memory_space<vmem>>, vector<4x256xf32>
    %c2_150 = arith.constant 2 : index
    %c1_151 = arith.constant 1 : index
    %c0_152 = arith.constant 0 : index
    %c0_153 = arith.constant 0 : index
    %158 = vector.load %arg6[%c2_150, %c1_151, %c0_152, %c0_153] : memref<3x3x4x4xf32, #tpu.memory_space<vmem>>, vector<1x1x4x4xf32>
    %159 = vector.shape_cast %158 : vector<1x1x4x4xf32> to vector<4x4xf32>
    %cst_154 = arith.constant dense<0.000000e+00> : vector<4x256xf32>
    %160 = tpu.matmul %159, %157, %cst_154 {dimension_numbers = #tpu.dot_dimension_numbers<[1], [0], [0], [1], [0, 0, 1, 1], [], []>} : vector<4x4xf32>, vector<4x256xf32>, vector<4x256xf32> -> vector<4x256xf32>
    %161 = arith.addf %156, %160 : vector<4x256xf32>
    %c0_155 = arith.constant 0 : index
    %c145_156 = arith.constant 145 : index
    %162 = vector.load %arg11[%c0_155, %c145_156] : memref<4x512xf32, #tpu.memory_space<vmem>>, vector<4x256xf32>
    %c1_157 = arith.constant 1 : index
    %c0_158 = arith.constant 0 : index
    %163 = vector.load %arg1[%c1_157, %c0_158] : memref<2x256xf32, #tpu.memory_space<vmem>>, vector<1x256xf32>
    %164 = vector.broadcast %163 : vector<1x256xf32> to vector<4x256xf32>
    %165 = arith.mulf %162, %164 : vector<4x256xf32>
    %c2_159 = arith.constant 2 : index
    %c2_160 = arith.constant 2 : index
    %c0_161 = arith.constant 0 : index
    %c0_162 = arith.constant 0 : index
    %166 = vector.load %arg6[%c2_159, %c2_160, %c0_161, %c0_162] : memref<3x3x4x4xf32, #tpu.memory_space<vmem>>, vector<1x1x4x4xf32>
    %167 = vector.shape_cast %166 : vector<1x1x4x4xf32> to vector<4x4xf32>
    %cst_163 = arith.constant dense<0.000000e+00> : vector<4x256xf32>
    %168 = tpu.matmul %167, %165, %cst_163 {dimension_numbers = #tpu.dot_dimension_numbers<[1], [0], [0], [1], [0, 0, 1, 1], [], []>} : vector<4x4xf32>, vector<4x256xf32>, vector<4x256xf32> -> vector<4x256xf32>
    %169 = arith.addf %161, %168 : vector<4x256xf32>
    %170 = vector.shape_cast %169 : vector<4x256xf32> to vector<1x4x256xf32>
    %cst_164 = arith.constant dense<0.000000e+00> : vector<1xf32>
    %171 = vector.multi_reduction <add>, %170, %cst_164 [1, 2] : vector<1x4x256xf32> to vector<1xf32>
    %172 = vector.shape_cast %171 : vector<1xf32> to vector<1x1x1xf32>
    %173 = vector.extract %172[0, 0, 0] : f32 from vector<1x1x1xf32>
    %174 = arith.mulf %169, %169 : vector<4x256xf32>
    %175 = vector.shape_cast %174 : vector<4x256xf32> to vector<1x4x256xf32>
    %cst_165 = arith.constant dense<0.000000e+00> : vector<1xf32>
    %176 = vector.multi_reduction <add>, %175, %cst_165 [1, 2] : vector<1x4x256xf32> to vector<1xf32>
    %177 = vector.shape_cast %176 : vector<1xf32> to vector<1x1x1xf32>
    %178 = vector.extract %177[0, 0, 0] : f32 from vector<1x1x1xf32>
    %cst_166 = arith.constant 1.024000e+03 : f32
    %179 = arith.divf %173, %cst_166 : f32
    %cst_167 = arith.constant 1.024000e+03 : f32
    %180 = arith.divf %178, %cst_167 : f32
    %181 = arith.mulf %179, %179 : f32
    %182 = arith.subf %180, %181 : f32
    %cst_168 = arith.constant 9.99999974E-6 : f32
    %183 = arith.addf %182, %cst_168 : f32
    %184 = math.rsqrt %183 : f32
    %c0_169 = arith.constant 0 : index
    %c0_170 = arith.constant 0 : index
    %185 = vector.load %arg7[%c0_169, %c0_170] : memref<4x1xf32, #tpu.memory_space<vmem>>, vector<4x1xf32>
    %186 = vector.broadcast %184 : f32 to vector<4x1xf32>
    %187 = arith.mulf %185, %186 : vector<4x1xf32>
    %c0_171 = arith.constant 0 : index
    %c0_172 = arith.constant 0 : index
    %188 = vector.load %arg8[%c0_171, %c0_172] : memref<4x1xf32, #tpu.memory_space<vmem>>, vector<4x1xf32>
    %189 = vector.broadcast %179 : f32 to vector<4x1xf32>
    %190 = arith.mulf %189, %187 : vector<4x1xf32>
    %191 = arith.subf %188, %190 : vector<4x1xf32>
    %192 = vector.broadcast %187 : vector<4x1xf32> to vector<4x256xf32>
    %193 = arith.mulf %169, %192 : vector<4x256xf32>
    %194 = vector.broadcast %191 : vector<4x1xf32> to vector<4x256xf32>
    %195 = arith.addf %193, %194 : vector<4x256xf32>
    %196 = arith.addf %1, %195 : vector<4x256xf32>
    %cst_173 = arith.constant 5.000000e-01 : f32
    %197 = vector.broadcast %cst_173 : f32 to vector<4x256xf32>
    %198 = arith.mulf %197, %196 : vector<4x256xf32>
    %cst_174 = arith.constant 0.707106769 : f32
    %199 = vector.broadcast %cst_174 : f32 to vector<4x256xf32>
    %200 = arith.mulf %196, %199 : vector<4x256xf32>
    %201 = math.erf %200 : vector<4x256xf32>
    %cst_175 = arith.constant 1.000000e+00 : f32
    %202 = vector.broadcast %cst_175 : f32 to vector<4x256xf32>
    %203 = arith.addf %202, %201 : vector<4x256xf32>
    %204 = arith.mulf %198, %203 : vector<4x256xf32>
    %205 = vector.shape_cast %204 : vector<4x256xf32> to vector<1x4x256xf32>
    %c0_176 = arith.constant 0 : index
    %c0_177 = arith.constant 0 : index
    %c0_178 = arith.constant 0 : index
    %206 = vector.load %arg9[%c0_176, %c0_177, %c0_178] : memref<1x4x256xf32, #tpu.memory_space<vmem>>, vector<1x4x256xf32>
    tpu.vector_store %arg9[%c0_176, %c0_177, %c0_178], %205 {strides = array<i32>} : memref<1x4x256xf32, #tpu.memory_space<vmem>>, vector<1x4x256xf32>,
    return
  }
  func.func @transform_0(%arg0: i32) -> (i32, i32) {
    %c0_i32 = arith.constant 0 : i32
    %c0_i32_0 = arith.constant 0 : i32
    %c0_i32_1 = arith.constant 0 : i32
    return %c0_i32, %c0_i32_0 : i32, i32
  }
  func.func @transform_1(%arg0: i32) -> (i32, i32, i32) {
    %c0_i32 = arith.constant 0 : i32
    %c0_i32_0 = arith.constant 0 : i32
    %c0_i32_1 = arith.constant 0 : i32
    return %arg0, %c0_i32, %c0_i32_0 : i32, i32, i32
  }
  func.func @transform_2(%arg0: i32) -> (i32, i32, i32, i32) {
    %c0_i32 = arith.constant 0 : i32
    %c0_i32_0 = arith.constant 0 : i32
    %c0_i32_1 = arith.constant 0 : i32
    %c0_i32_2 = arith.constant 0 : i32
    %c0_i32_3 = arith.constant 0 : i32
    return %c0_i32, %c0_i32_0, %c0_i32_1, %c0_i32_2 : i32, i32, i32, i32
  }
  func.func @transform_3(%arg0: i32) -> (i32, i32) {
    %c0_i32 = arith.constant 0 : i32
    %c0_i32_0 = arith.constant 0 : i32
    %c0_i32_1 = arith.constant 0 : i32
    return %c0_i32, %c0_i32_0 : i32, i32
  }
  func.func @transform_4(%arg0: i32) -> (i32, i32) {
    %c0_i32 = arith.constant 0 : i32
    %c0_i32_0 = arith.constant 0 : i32
    %c0_i32_1 = arith.constant 0 : i32
    return %c0_i32, %c0_i32_0 : i32, i32
  }
  func.func @transform_5(%arg0: i32) -> (i32, i32, i32, i32) {
    %c0_i32 = arith.constant 0 : i32
    %c0_i32_0 = arith.constant 0 : i32
    %c0_i32_1 = arith.constant 0 : i32
    %c0_i32_2 = arith.constant 0 : i32
    %c0_i32_3 = arith.constant 0 : i32
    return %c0_i32, %c0_i32_0, %c0_i32_1, %c0_i32_2 : i32, i32, i32, i32
  }
  func.func @transform_6(%arg0: i32) -> (i32, i32) {
    %c0_i32 = arith.constant 0 : i32
    %c0_i32_0 = arith.constant 0 : i32
    %c0_i32_1 = arith.constant 0 : i32
    return %c0_i32, %c0_i32_0 : i32, i32
  }
  func.func @transform_7(%arg0: i32) -> (i32, i32) {
    %c0_i32 = arith.constant 0 : i32
    %c0_i32_0 = arith.constant 0 : i32
    %c0_i32_1 = arith.constant 0 : i32
    return %c0_i32, %c0_i32_0 : i32, i32
  }
  func.func @transform_8(%arg0: i32) -> (i32, i32, i32) {
    %c0_i32 = arith.constant 0 : i32
    %c0_i32_0 = arith.constant 0 : i32
    %c0_i32_1 = arith.constant 0 : i32
    return %arg0, %c0_i32, %c0_i32_0 : i32, i32, i32
  }
}

</mosaic_0001>

<bundles_post_ra>
// kernel: double_conv.1
= control target key start
LH: loop header
LB: loop body
LE: loop exit
PB: predicated region body
PF: predicated region fallthrough
CT: control target
= control target key end

     0   :  { %s2533_s27 = smov 0   ;;  %s2873_s0 = inlined_call_operand.vmem [shape: f32[2,256], index: 0, kind: input, shape index: {}]   ;;  %s2874_s1 = inlined_call_operand.vmem [shape: f32[2,4,256], index: 1, kind: input, shape index: {}]   ;;  %s2875_s2 = inlined_call_operand.vmem [shape: f32[3,3,4,4], index: 2, kind: input, shape index: {}]   ;;  %s2876_s3 = inlined_call_operand.vmem [shape: f32[4,1], index: 3, kind: input, shape index: {}]   ;;  %s2877_s4 = inlined_call_operand.vmem [shape: f32[4,1], index: 4, kind: input, shape index: {}]   ;;  %s2878_s5 = inlined_call_operand.vmem [shape: f32[3,3,4,4], index: 5, kind: input, shape index: {}]   ;;  %s2879_s6 = inlined_call_operand.vmem [shape: f32[4,1], index: 6, kind: input, shape index: {}]   ;;  %s2880_s7 = inlined_call_operand.vmem [shape: f32[4,1], index: 7, kind: input, shape index: {}]   ;;  %s2881_s8 = inlined_call_operand.vmem [shape: f32[2,4,256], index: 8, kind: output, shape index: {}]  }
   0x1 LB: > { %s2338_s28 = sadd.s32 4294967295, %s2476_s27   ;;  %p2342_p0 = scmp.ge.s32.totalorder %s2476_s27, 1  ;;  %s2476_s27 = sphi %s2533_s27, %s18_s27  }
   0x2   : > { %p262_p1 = scmp.lt.s32.totalorder %s2476_s27, 3 }
   0x4   : > { %p263_p2 = pnand %p2342_p0, %p262_p1 }
   0x5   : > { %p296_p3 = scmp.lt.s32.totalorder (!%p263_p2), %s2338_s28, 1  ;;  %s2479_s15 = smov (!%p263_p2), 111  }
   0x6   : > { %266 = sbr.rel (%p263_p2) target bundleno = 1725 (0x6bd), region = 52  ;;  %s2480_s16 = smov (!%p263_p2), 127  }
   0x7   : > { %s2481_s17 = smov (!%p263_p2), 113   ;;  %s2482_s18 = smov (!%p263_p2), 1  }
   0x8   : > { %s2483_s19 = smov (!%p263_p2), 15   ;;  %s2484_s20 = smov (!%p263_p2), 17  }
   0x9   : > { %s2485_s21 = smov (!%p263_p2), 16   ;;  %s2486_s22 = smov (!%p263_p2), 112  }
   0xb   : > { %v314_v0 = vlaneseq  ;;  %v2478_v1 = vmov 0.0   ;;  %v312_v2 = vld [vmem:[%s2873_s0] ss:$2 sm:$0x3]  ;;  %s2885_s28 = smov (!%p296_p3, %s2338_s28), 1  ;;  %vm326_vm0 = vcmask 908288  }
   0xc   : > { %307 = vst [vmem:[#allocation2] sm:$0xff] %v2478_v1  ;;  %308 = vst [vmem:[#allocation2 + $0x8] sm:$0xff] %v2478_v1  ;;  %420 = vmatprep.mubr.f32.mxu0 %v2478_v1  ;;  %510 = vmatprep.mubr.f32.mxu1 %v2478_v1  ;;  %v2354_v4 = vld [vmem:[%s2873_s0 + $0x1] ss:$2 sm:$0x3]  ;;  %s2882_s11 = sshll.u32 %s2885_s28, 3 }
   0xd   : > { %1298 = vst [vmem:[#allocation3] sm:$0xff] %v2478_v1  ;;  %1299 = vst [vmem:[#allocation3 + $0x8] sm:$0xff] %v2478_v1  ;;  %v315_v3 = vshrl.u32 %v314_v0, 7  ;;  %s300_s14 = scalar_lea.vmem %s2874_s1, %s2882_s11  ;;  %vm534_vm1 = vcmask 924672   ;;  %vm639_vm2 = vcmask 1039360   ;;  %vm656_vm3 = vcmask 7168  }
   0xe   : > { %v2569_v12 = vld [vmem:[%s300_s14] sm:$0xff]  ;;  %vm344_vm4 = vcmask 130048   ;;  %vm351_vm5 = vcmask 1043456   ;;  %vm551_vm6 = vcmask 121856   ;;  %vm347_vm7 = vcmask 31744  }
   0xf   : > { %v2553_v5 = vsub.s32 0, %v315_v3  ;;  %v2555_v6 = vsub.s32 1, %v315_v3  ;;  %309 = vst [vmem:[#allocation2 + $0x4] sm:$0xff] %v2569_v12  ;;  %v2583_v18 = vcombine.high %v2569_v12, %v2569_v12  ;;  %v2347_v50 = vld [vmem:[%s2875_s2 + $0x4] sm:$0xf]  ;;  %vm436_vm8 = vcmask 138240  }
  0x10   : > { %vm1043_vm9 = vcmask 916480  }
  0x11   : > { %v317_v7 = vrot.slane %v312_v2, %v2553_v5  ;;  %v321_v8 = vrot.slane %v312_v2, %v2555_v6  ;;  %v525_v9 = vrot.slane %v2354_v4, %v2553_v5  ;;  %v529_v10 = vrot.slane %v2354_v4, %v2555_v6 }
  0x13   : > { %v322_v11 = vcombine.low %v317_v7, %v321_v8  ;;  %v530_v13 = vcombine.low %v525_v9, %v529_v10  ;;  %v1031_v17 = vld [vmem:[#allocation2 + $0xc] sm:$0xf] }
  0x14   : > { %v825_v30 = vld [vmem:[#allocation2 + $0xc] sm:$0xf] }
  0x15   : > { %323 = vrot.lane.b32.xlu0 %v322_v11, %s2479_s15  ;;  %636 = vrot.lane.b32.xlu1 %v322_v11, %s2480_s16  ;;  %v928_v34 = vld [vmem:[#allocation2 + $0xc] sm:$0xf] }
  0x16   : > { %v310_v14 = vld [vmem:[#allocation2] sm:$0xff]  ;;  %v311_v15 = vld [vmem:[#allocation2 + $0x8] sm:$0xf]  ;;  %v1127_v59 = vld [vmem:[#allocation2 + $0xc] sm:$0xf] }
  0x17   : > { %v337_v16 = vcombine.high %v310_v14, %v310_v14  ;;  %v635_v22 = vld [vmem:[#allocation2 + $0x8] sm:$0xf] }
  0x18   : > { %v518_v26 = vld [vmem:[#allocation2 + $0x8] sm:$0xf] }
  0x19   : > { %531 = vrot.lane.b32.xlu0 %v530_v13, %s2481_s17  ;;  %826 = vrot.lane.b32.xlu1 %v530_v13, %s2482_s18 }
  0x1d   : > { %929 = vrot.lane.b32.xlu0 %v322_v11, %s2483_s19  ;;  %1128 = vrot.lane.b32.xlu1 %v530_v13, %s2484_s20 }
  0x21   : > { %338 = vrot.lane.b32.xlu0 %v310_v14, %s2485_s21  ;;  %342 = vrot.lane.b32.xlu1 %v311_v15, %s2485_s21 }
  0x25   : > { %340 = vrot.lane.b32.xlu0 %v337_v16, %s2485_s21  ;;  %1041 = vrot.lane.b32.xlu1 %v1031_v17, %s2486_s22 }
  0x29   : > { %1039 = vrot.lane.b32.xlu0 %v2583_v18, %s2486_s22 }
  0x87   : > { %v324_v19 = vpop.permute.xlu0 %323  ;;  %v637_v20 = vpop.permute.xlu1 %636 }
  0x88   : > { %v325_v21 = vrot.slane %v324_v19, 4  ;;  %v638_v24 = vrot.slane %v637_v20, 4 }
  0x8a   : > { %v331_v23 = vmul.f32 %v325_v21, %v311_v15  ;;  %v644_v28 = vmul.f32 %v638_v24, %v635_v22  ;;  %v327_v39 = vsel %vm326_vm0, %v325_v21, %v324_v19  ;;  %v640_v45 = vsel %vm639_vm2, %v638_v24, %v637_v20  ;;  %v2355_v22 = vld [vmem:[%s2875_s2 + $0x8] sm:$0xf] }
  0x8b   : > { %v532_v25 = vpop.permute.xlu0 %531  ;;  %v827_v27 = vpop.permute.xlu1 %826  ;;  %v330_v43 = vmul.f32 %v327_v39, %v310_v14  ;;  %v643_v51 = vmul.f32 %v640_v45, %v310_v14  ;;  %v2371_v39 = vld [vmem:[%s2875_s2 + $0x18] sm:$0xf] }
  0x8c   : > { %v533_v29 = vrot.slane %v532_v25, 4  ;;  %434 = vrot.lane.b32.xlu0 %v331_v23, %s2484_s20  ;;  %v828_v32 = vrot.slane %v827_v27, 4 }
  0x8d   : > { %v429_v57 = vcombine.high %v330_v43, %v330_v43  ;;  %v649_v60 = vcombine.high %v643_v51, %v643_v51 }
  0x8e   : > { %v539_v31 = vmul.f32 %v533_v29, %v518_v26  ;;  %v833_v35 = vmul.f32 %v828_v32, %v825_v30  ;;  %v535_v40 = vsel %vm534_vm1, %v533_v29, %v532_v25  ;;  %v829_v46 = vsel %vm656_vm3, %v828_v32, %v827_v27  ;;  %v332_v27 = vld [vmem:[%s2875_s2] sm:$0xf] }
  0x8f   : > { %v930_v33 = vpop.permute.xlu0 %929  ;;  %v1129_v37 = vpop.permute.xlu1 %1128  ;;  %v538_v44 = vmul.f32 %v535_v40, %v310_v14  ;;  %v832_v52 = vmul.f32 %v829_v46, %v2569_v12  ;;  %v2379_v46 = vld [vmem:[%s2875_s2 + $0x20] sm:$0xf] }
  0x90   : > { %v931_v36 = vrot.slane %v930_v33, 4  ;;  %549 = vrot.lane.b32.xlu1 %v539_v31, %s2483_s19  ;;  %654 = vrot.lane.b32.xlu0 %v644_v28, %s2482_s18  ;;  %v1130_v58 = vrot.slane %v1129_v37, 4  ;;  %v2363_v28 = vld [vmem:[%s2875_s2 + $0x10] sm:$0xf] }
  0x91   : > { %v544_v55 = vcombine.high %v538_v44, %v538_v44  ;;  %v838_v56 = vcombine.high %v832_v52, %v832_v52 }
  0x92   : > { %v936_v38 = vmul.f32 %v931_v36, %v928_v34  ;;  %v932_v53 = vsel %vm551_vm6, %v931_v36, %v930_v33  ;;  %v1131_v61 = vsel %vm436_vm8, %v1130_v58, %v1129_v37  ;;  %v1135_v62 = vmul.f32 %v1130_v58, %v1127_v59 }
  0x93   : > { %v339_v41 = vpop.permute.xlu0 %338  ;;  %v343_v42 = vpop.permute.xlu1 %342  ;;  %v935_v54 = vmul.f32 %v932_v53, %v2569_v12  ;;  %v1134_v63 = vmul.f32 %v1131_v61, %v2569_v12 }
  0x94   : > { %843 = vrot.lane.b32.xlu1 %v833_v35, %s2480_s16  ;;  %946 = vrot.lane.b32.xlu0 %v936_v38, %s2481_s17  ;;  %v2367_v38 = vld [vmem:[%s2875_s2 + $0x14] sm:$0xf] }
  0x95   : > { %v941_v0 = vcombine.high %v935_v54, %v935_v54  ;;  %v1140_v2 = vcombine.high %v1134_v63, %v1134_v63 }
  0x97   : > { %v341_v47 = vpop.permute.xlu0 %340  ;;  %v1042_v4 = vpop.permute.xlu1 %1041 }
  0x98   : > { %545 = vrot.lane.b32.xlu0 %v538_v44, %s2483_s19  ;;  %430 = vrot.lane.b32.xlu1 %v330_v43, %s2484_s20  ;;  %v346_v48 = vsel %vm344_vm4, %v341_v47, %v343_v42  ;;  %v345_v49 = vsel %vm344_vm4, %v339_v41, %v341_v47  ;;  %v2375_v44 = vld [vmem:[%s2875_s2 + $0x1c] sm:$0xf] }
  0x99   : > { %2348 = vmatprep.subr.msk.mxu0 %vm351_vm5, %v346_v48 }
  0x9a   : > { %2349 = vmatpush1.msk.msra.mxu0 %vm351_vm5, %v345_v49 }
  0x9b   : > { %2350 = vmatmul.mubr.msk.f32.vlgmr.msra.gmra.mxu0 %vm347_vm7, %v2347_v50  ;;  %v1040_v3 = vpop.permute.xlu0 %1039 }
  0x9c   : > { %839 = vrot.lane.b32.xlu0 %v832_v52, %s2480_s16  ;;  %650 = vrot.lane.b32.xlu1 %v643_v51, %s2482_s18  ;;  %v1045_v35 = vsel %vm1043_vm9, %v1040_v3, %v1042_v4 }
  0x9d   : > { %625 = vmatprep.mubr.f32.mxu0 %v2478_v1 }
  0xa0   : > { %547 = vrot.lane.b32.xlu0 %v544_v55, %s2483_s19  ;;  %942 = vrot.lane.b32.xlu1 %v935_v54, %s2481_s17 }
  0xa4   : > { %841 = vrot.lane.b32.xlu0 %v838_v56, %s2480_s16  ;;  %432 = vrot.lane.b32.xlu1 %v429_v57, %s2484_s20 }
  0xa8   : > { %1037 = vrot.lane.b32.xlu0 %v2569_v12, %s2486_s22  ;;  %652 = vrot.lane.b32.xlu1 %v649_v60, %s2482_s18 }
  0xac   : > { %944 = vrot.lane.b32.xlu1 %v941_v0, %s2481_s17  ;;  %1145 = vrot.lane.b32.xlu0 %v1135_v62, %s2479_s15 }
  0xb0   : > { %1143 = vrot.lane.b32.xlu1 %v1140_v2, %s2479_s15 }
  0xb4   : > { %1141 = vrot.lane.b32.xlu1 %v1134_v63, %s2479_s15 }
  0xfe   : > { %v435_v7 = vpop.permute.xlu0 %434 }
 0x102   : > { %v550_v8 = vpop.permute.xlu1 %549  ;;  %v655_v9 = vpop.permute.xlu0 %654 }
 0x106   : > { %v844_v10 = vpop.permute.xlu1 %843  ;;  %v947_v11 = vpop.permute.xlu0 %946 }
 0x10a   : > { %v546_v13 = vpop.permute.xlu0 %545  ;;  %v431_v14 = vpop.permute.xlu1 %430 }
 0x10e   : > { %v840_v15 = vpop.permute.xlu0 %839  ;;  %v651_v16 = vpop.permute.xlu1 %650 }
 0x112   : > { %v548_v17 = vpop.permute.xlu0 %547  ;;  %v943_v19 = vpop.permute.xlu1 %942 }
 0x113   : > { %v552_v20 = vsel %vm551_vm6, %v546_v13, %v548_v17  ;;  %v553_v21 = vsel %vm551_vm6, %v548_v17, %v550_v8 }
 0x114   : > { %2356 = vmatprep.subr.msk.mxu0 %vm351_vm5, %v553_v21 }
 0x115   : > { %2357 = vmatpush1.msk.msra.mxu0 %vm351_vm5, %v552_v20 }
 0x116   : > { %v842_v23 = vpop.permute.xlu0 %841  ;;  %v433_v24 = vpop.permute.xlu1 %432  ;;  %2358 = vmatmul.mubr.msk.f32.vlgmr.msra.gmra.mxu0 %vm347_vm7, %v2355_v22  ;;  %2364 = vmatprep.subr.msk.mxu0 %vm351_vm5, %v2583_v18 }
 0x117   : > { %v438_v25 = vsel %vm436_vm8, %v433_v24, %v435_v7  ;;  %v437_v26 = vsel %vm436_vm8, %v431_v14, %v433_v24  ;;  %2365 = vmatpush1.msk.msra.mxu0 %vm351_vm5, %v2569_v12  ;;  %815 = vmatprep.mubr.f32.mxu0 %v2478_v1  ;;  %v2359_v12 = vld [vmem:[%s2875_s2 + $0xc] sm:$0xf]  ;;  %v846_v32 = vsel %vm639_vm2, %v842_v23, %v844_v10 }
 0x118   : > { %2351 = vmatprep.subr.msk.mxu1 %vm351_vm5, %v438_v25  ;;  %v845_v33 = vsel %vm639_vm2, %v840_v15, %v842_v23 }
 0x119   : > { %2352 = vmatpush1.msk.msra.mxu1 %vm351_vm5, %v437_v26 }
 0x11a   : > { %2353 = vmatmul.mubr.msk.f32.vlgmr.msra.gmra.mxu1 %vm347_vm7, %v332_v27  ;;  %v653_v18 = vpop.permute.xlu1 %652  ;;  %2366 = vmatmul.mubr.msk.f32.vlgmr.msra.gmra.mxu0 %vm347_vm7, %v2363_v28  ;;  %v1038_v31 = vpop.permute.xlu0 %1037 }
 0x11b   : > { %v657_v29 = vsel %vm656_vm3, %v651_v16, %v653_v18  ;;  %v658_v30 = vsel %vm656_vm3, %v653_v18, %v655_v9  ;;  %730 = vmatprep.mubr.f32.mxu1 %v2478_v1  ;;  %1021 = vmatprep.mubr.f32.mxu0 %v2478_v1  ;;  %v1044_v40 = vsel %vm1043_vm9, %v1038_v31, %v1040_v3 }
 0x11c   : > { %2360 = vmatprep.subr.msk.mxu1 %vm351_vm5, %v658_v30 }
 0x11d   : > { %2361 = vmatpush1.msk.msra.mxu1 %vm351_vm5, %v657_v29 }
 0x11e   : > { %2362 = vmatmul.mubr.msk.f32.vlgmr.msra.gmra.mxu1 %vm347_vm7, %v2359_v12  ;;  %2368 = vmatprep.subr.msk.mxu1 %vm351_vm5, %v846_v32  ;;  %v945_v34 = vpop.permute.xlu1 %944  ;;  %v1146_v41 = vpop.permute.xlu0 %1145 }
 0x11f   : > { %v948_v36 = vsel %vm534_vm1, %v943_v19, %v945_v34  ;;  %v949_v37 = vsel %vm534_vm1, %v945_v34, %v947_v11  ;;  %2369 = vmatpush1.msk.msra.mxu1 %vm351_vm5, %v845_v33  ;;  %918 = vmatprep.mubr.f32.mxu1 %v2478_v1 }
 0x120   : > { %2372 = vmatprep.subr.msk.mxu0 %vm351_vm5, %v949_v37  ;;  %2376 = vmatprep.subr.msk.mxu1 %vm351_vm5, %v1045_v35 }
 0x121   : > { %2373 = vmatpush1.msk.msra.mxu0 %vm351_vm5, %v948_v36 }
 0x122   : > { %2370 = vmatmul.mubr.msk.f32.vlgmr.msra.gmra.mxu1 %vm347_vm7, %v2367_v38  ;;  %v1144_v42 = vpop.permute.xlu1 %1143  ;;  %2374 = vmatmul.mubr.msk.f32.vlgmr.msra.gmra.mxu0 %vm347_vm7, %v2371_v39 }
 0x123   : > { %2377 = vmatpush1.msk.msra.mxu1 %vm351_vm5, %v1044_v40  ;;  %v1148_v43 = vsel %vm326_vm0, %v1144_v42, %v1146_v41  ;;  %1117 = vmatprep.mubr.f32.mxu1 %v2478_v1 }
 0x124   : > { %2380 = vmatprep.subr.msk.mxu0 %vm351_vm5, %v1148_v43  ;;  %1220 = vmatprep.mubr.f32.mxu0 %v2478_v1 }
 0x126   : > { %2378 = vmatmul.mubr.msk.f32.vlgmr.msra.gmra.mxu1 %vm347_vm7, %v2375_v44  ;;  %v1142_v45 = vpop.permute.xlu1 %1141 }
 0x127   : > { %v1147_v47 = vsel %vm326_vm0, %v1142_v45, %v1144_v42  ;;  %1411 = vmatprep.mubr.f32.mxu1 %v2478_v1  ;;  %v2487_v42 = vmov 0  }
 0x128   : > { %2381 = vmatpush1.msk.msra.mxu0 %vm351_vm5, %v1147_v47  ;;  %2453 = vset.pattern.permute.xlu0 %v2487_v42 }
 0x129   : > { %2382 = vmatmul.mubr.msk.f32.vlgmr.msra.gmra.mxu0 %vm347_vm7, %v2379_v46  ;;  %2454 = vset.pattern.permute.xlu1 %v2487_v42  ;;  %v1267_v46 = vld [vmem:[%s2876_s3] sm:$0xf] }
 0x12a   : > { %1500 = vmatprep.mubr.f32.mxu0 %v2478_v1 }
 0x15b   : > { %v422_v48 = vpop.f32.mrf.mxu0 }
 0x15d   : > { %v424_v49 = vpop.f32.mrf.mxu0 }
 0x1d6   : > { %v627_v50 = vpop.f32.mrf.mxu0 }
 0x1d8   : > { %v629_v51 = vpop.f32.mrf.mxu0 }
 0x1da   : > { %v512_v52 = vpop.f32.mrf.mxu1  ;;  %v817_v53 = vpop.f32.mrf.mxu0 }
 0x1db   : > { %v513_v54 = vadd.f32 %v512_v52, %v422_v48  ;;  %v1307_v48 = vld [vmem:[%s2873_s0] ss:$2 sm:$0x3] }
 0x1dc   : > { %v514_v55 = vpop.f32.mrf.mxu1  ;;  %v819_v59 = vpop.f32.mrf.mxu0 }
 0x1dd   : > { %v632_v56 = vadd.f32 %v627_v50, %v513_v54  ;;  %v515_v57 = vadd.f32 %v514_v55, %v424_v49  ;;  %v1316_v54 = vrot.slane %v1307_v48, %v2555_v6  ;;  %v2390_v55 = vld [vmem:[%s2873_s0 + $0x1] ss:$2 sm:$0x3] }
 0x1de   : > { %v732_v58 = vpop.f32.mrf.mxu1 }
 0x1df   : > { %v633_v60 = vadd.f32 %v629_v51, %v515_v57  ;;  %v737_v61 = vadd.f32 %v732_v58, %v632_v56  ;;  %v1270_v51 = vld [vmem:[%s2877_s4] sm:$0xf]  ;;  %v1514_v58 = vrot.slane %v2390_v55, %v2553_v5 }
 0x1e0   : > { %v734_v62 = vpop.f32.mrf.mxu1 }
 0x1e1   : > { %v822_v63 = vadd.f32 %v817_v53, %v737_v61  ;;  %v738_v0 = vadd.f32 %v734_v62, %v633_v60  ;;  %v1312_v53 = vrot.slane %v1307_v48, %v2553_v5 }
 0x1e2   : > { %v920_v2 = vpop.f32.mrf.mxu1  ;;  %v1023_v3 = vpop.f32.mrf.mxu0 }
 0x1e3   : > { %v823_v4 = vadd.f32 %v819_v59, %v738_v0  ;;  %v925_v7 = vadd.f32 %v920_v2, %v822_v63  ;;  %v1317_v57 = vcombine.low %v1312_v53, %v1316_v54  ;;  %v1518_v59 = vrot.slane %v2390_v55, %v2555_v6 }
 0x1e4   : > { %v922_v8 = vpop.f32.mrf.mxu1  ;;  %v1025_v9 = vpop.f32.mrf.mxu0 }
 0x1e5   : > { %v1028_v10 = vadd.f32 %v1023_v3, %v925_v7  ;;  %v926_v11 = vadd.f32 %v922_v8, %v823_v4  ;;  %v1519_v60 = vcombine.low %v1514_v58, %v1518_v59  ;;  %v2111_v59 = vld [vmem:[#allocation3 + $0xc] sm:$0xf] }
 0x1e6   : > { %v1119_v13 = vpop.f32.mrf.mxu1 }
 0x1e7   : > { %v1029_v14 = vadd.f32 %v1025_v9, %v926_v11  ;;  %v1124_v15 = vadd.f32 %v1119_v13, %v1028_v10  ;;  %v1810_v9 = vld [vmem:[#allocation3 + $0xc] sm:$0xf] }
 0x1e8   : > { %v1121_v16 = vpop.f32.mrf.mxu1 }
 0x1e9   : > { %v1125_v17 = vadd.f32 %v1121_v16, %v1029_v14  ;;  %v1222_v19 = vpop.f32.mrf.mxu0 }
 0x1ea   : > { %v2698_v20 = vadd.f32 %v1222_v19, %v1124_v15 }
 0x1eb   : > { %v1224_v21 = vpop.f32.mrf.mxu0 }
 0x1ec   : > { %v2700_v22 = vadd.f32 %v1224_v21, %v1125_v17  ;;  %v1241_v23 = vmul.f32 %v2698_v20, %v2698_v20  ;;  %v1229_v24 = vsel %vm351_vm5, %v2698_v20, 0.0  ;;  %v1913_v21 = vld [vmem:[#allocation3 + $0xc] sm:$0xf] }
 0x1ee   : > { %v1230_v25 = vsel %vm351_vm5, %v2700_v22, 0.0  ;;  %v1242_v26 = vmul.f32 %v2700_v22, %v2700_v22  ;;  %v1243_v28 = vsel %vm351_vm5, %v1241_v23, 0.0 }
 0x1ef   : > { %v1231_v27 = vadd.f32 %v1230_v25, %v1229_v24 }
 0x1f0   : > { %v1244_v18 = vsel %vm351_vm5, %v1242_v26, 0.0  ;;  %v2016_v26 = vld [vmem:[#allocation3 + $0xc] sm:$0xf] }
 0x1f1   : > { %1232 = vadd.xlane.f32.xlu0 %v1231_v27  ;;  %v1245_v29 = vadd.f32 %v1244_v18, %v1243_v28 }
 0x1f3   : > { %1246 = vadd.xlane.f32.xlu1 %v1245_v29 }
 0x27a   : > { %v1233_v30 = vpop.xlane.xlu0 %1232 }
 0x27b   : > { %v1234_v12 = vrot.slane %v1233_v30, 4 }
 0x27c   : > { %v1247_v31 = vpop.xlane.xlu1 %1246 }
 0x27d   : > { %v1235_v32 = vadd.f32 %v1234_v12, %v1233_v30  ;;  %v1248_v33 = vrot.slane %v1247_v31, 4 }
 0x27f   : > { %v1236_v34 = vrot.slane %v1235_v32, 2  ;;  %v1249_v35 = vadd.f32 %v1248_v33, %v1247_v31 }
 0x281   : > { %v1250_v36 = vrot.slane %v1249_v35, 2  ;;  %v1237_v37 = vadd.f32 %v1236_v34, %v1235_v32 }
 0x283   : > { %v1238_v38 = vrot.slane %v1237_v37, 1  ;;  %v1251_v39 = vadd.f32 %v1250_v36, %v1249_v35 }
 0x285   : > { %v1239_v40 = vadd.f32 %v1238_v38, %v1237_v37  ;;  %v1252_v41 = vrot.slane %v1251_v39, 1 }
 0x287   : > { %2423 = vpush %v1239_v40  ;;  %v1253_v43 = vadd.f32 %v1252_v41, %v1251_v39 }
 0x289   : > { %2425 = vpush %v1253_v43 }
 0x2b8   : > { %s2424_s10 = spop %2423 }
 0x2b9   : > { %s1257_s12 = smul.f32 0.0009765625, %s2424_s10 }
 0x2ba   : > { %s2426_s13 = spop %2425 }
 0x2bb   : > { %s1261_s14 = smul.f32 %s1257_s12, %s1257_s12  ;;  %v1271_v50 = vstv %s1257_s12 }
 0x2bc   : > { %s1260_s23 = smul.f32 0.0009765625, %s2426_s13 }
 0x2be   : > { %s1262_s24 = ssub.f32 %s1260_s23, %s1261_s14 }
 0x2c0   : > { %s1263_s25 = sadd.f32 1e-05, %s1262_s24  ;;  %s2883_s24 = sshll.u32 %s2885_s28, 3 }
 0x2c1   : > { %s305_s29 = scalar_lea.vmem %s2881_s8, %s2883_s24 }
 0x2c2   : > { %v1264_v44 = vstv %s1263_s25 }
 0x2c3   : > { %2458 = vrsqrt.f32 %v1264_v44 }
 0x2d0   : > { %v2459_v45 = vpop.eup %2458 }
 0x2d1   : > { %2427 = vpush %v2459_v45 }
 0x302   : > { %s2428_s30 = spop %2427 }
 0x303   : > { %v1268_v47 = vstv %s2428_s30 }
 0x304   : > { %v1269_v49 = vmul.f32 %v1268_v47, %v1267_v46 }
 0x306   : > { %v1272_v52 = vmul.f32 %v1271_v50, %v1269_v49  ;;  %1276 = vperm.xlu0 %2453, %v1269_v49  }
 0x308   : > { %v1273_v56 = vsub.f32 %v1270_v51, %v1272_v52 }
 0x30a   : > { %1283 = vperm.xlu1 %2454, %v1273_v56  }
 0x30e   : > { %1318 = vrot.lane.b32.xlu1 %v1317_v57, %s2479_s15 }
 0x312   : > { %1520 = vrot.lane.b32.xlu1 %v1519_v60, %s2481_s17 }
 0x316   : > { %1623 = vrot.lane.b32.xlu1 %v1317_v57, %s2480_s16 }
 0x31a   : > { %1811 = vrot.lane.b32.xlu1 %v1519_v60, %s2482_s18 }
 0x31e   : > { %1914 = vrot.lane.b32.xlu1 %v1317_v57, %s2483_s19 }
 0x322   : > { %2112 = vrot.lane.b32.xlu1 %v1519_v60, %s2484_s20 }
 0x381   : > { %v1277_v61 = vpop.permute.xlu0 %1276 }
 0x382   : > { %v1279_v62 = vmul.f32 %v1277_v61, %v2698_v20  ;;  %v1280_v5 = vmul.f32 %v1277_v61, %v2700_v22 }
 0x385   : > { %v1284_v63 = vpop.permute.xlu1 %1283 }
 0x386   : > { %v1286_v6 = vadd.f32 %v1284_v63, %v1279_v62  ;;  %v1287_v0 = vadd.f32 %v1284_v63, %v1280_v5 }
 0x388   : > { %v1290_v2 = vmul.f32 0.70710677, %v1286_v6  ;;  %v1291_v3 = vmul.f32 0.70710677, %v1287_v0  ;;  %v1288_v15 = vmul.f32 0.5, %v1286_v6  ;;  %v1289_v19 = vmul.f32 0.5, %v1287_v0 }
 0x389   : > { %v1319_v4 = vpop.permute.xlu1 %1318 }
 0x38a   : > { %2460 = verf.f32 %v1290_v2  ;;  %v1320_v18 = vrot.slane %v1319_v4, 4 }
 0x38b   : > { %2462 = verf.f32 %v1291_v3 }
 0x38c   : > { %v1321_v12 = vsel %vm326_vm0, %v1320_v18, %v1319_v4 }
 0x38d   : > { %v1521_v7 = vpop.permute.xlu1 %1520 }
 0x38e   : > { %v1522_v34 = vrot.slane %v1521_v7, 4 }
 0x390   : > { %v1523_v38 = vsel %vm534_vm1, %v1522_v34, %v1521_v7  ;;  %v2383_v7 = vld [vmem:[%s2878_s5 + $0x4] sm:$0xf] }
 0x391   : > { %v1624_v8 = vpop.permute.xlu1 %1623 }
 0x392   : > { %v1625_v35 = vrot.slane %v1624_v8, 4 }
 0x394   : > { %v1626_v40 = vsel %vm639_vm2, %v1625_v35, %v1624_v8 }
 0x395   : > { %v1812_v10 = vpop.permute.xlu1 %1811 }
 0x396   : > { %v1813_v11 = vrot.slane %v1812_v10, 4 }
 0x397   : > { %v2461_v13 = vpop.eup %2460 }
 0x398   : > { %v2463_v14 = vpop.eup %2462  ;;  %v1294_v16 = vadd.f32 1.0, %v2461_v13  ;;  %v1818_v17 = vmul.f32 %v1813_v11, %v1810_v9  ;;  %v1814_v46 = vsel %vm656_vm3, %v1813_v11, %v1812_v10 }
 0x399   : > { %v1295_v20 = vadd.f32 1.0, %v2463_v14  ;;  %v1915_v22 = vpop.permute.xlu1 %1914 }
 0x39a   : > { %v1296_v23 = vmul.f32 %v1294_v16, %v1288_v15  ;;  %v1916_v24 = vrot.slane %v1915_v22, 4  ;;  %1828 = vrot.lane.b32.xlu1 %v1818_v17, %s2480_s16 }
 0x39b   : > { %v1297_v25 = vmul.f32 %v1295_v20, %v1289_v19  ;;  %v1326_v20 = vld [vmem:[%s2878_s5] sm:$0xf] }
 0x39c   : > { %v1921_v27 = vmul.f32 %v1916_v24, %v1913_v21  ;;  %v1917_v43 = vsel %vm551_vm6, %v1916_v24, %v1915_v22 }
 0x39d   : > { %v2737_v28 = vcombine.low %v1296_v23, %v1297_v25  ;;  %v2113_v47 = vpop.permute.xlu1 %2112  ;;  %v2761_v51 = vcombine.low %v1297_v25, %v1297_v25  ;;  %v2395_v25 = vld [vmem:[%s2878_s5 + $0xc] sm:$0xf] }
 0x39e   : > { %2026 = vrot.lane.b32.xlu1 %v2016_v26, %s2486_s22  ;;  %1931 = vrot.lane.b32.xlu0 %v1921_v27, %s2481_s17  ;;  %v2114_v50 = vrot.slane %v2113_v47, 4 }
 0x39f   : > { %1304 = vst [vmem:[#allocation3 + $0x4] sm:$0xff] %v2737_v28  ;;  %v1920_v45 = vmul.f32 %v1917_v43, %v2737_v28  ;;  %v1817_v48 = vmul.f32 %v1814_v46, %v2737_v28 }
 0x3a0   : > { %v2115_v53 = vsel %vm436_vm8, %v2114_v50, %v2113_v47  ;;  %v2119_v60 = vmul.f32 %v2114_v50, %v2111_v59 }
 0x3a1   : > { %v2118_v55 = vmul.f32 %v2115_v53, %v2737_v28  ;;  %v1926_v56 = vcombine.high %v1920_v45, %v1920_v45  ;;  %v1823_v57 = vcombine.high %v1817_v48, %v1817_v48 }
 0x3a3   : > { %v2124_v58 = vcombine.high %v2118_v55, %v2118_v55 }
 0x3a6   : > { %v1507_v29 = vld [vmem:[#allocation3] sm:$0xff]  ;;  %v1306_v30 = vld [vmem:[#allocation3 + $0x8] sm:$0xf] }
 0x3a7   : > { %1332 = vrot.lane.b32.xlu0 %v1507_v29, %s2485_s21  ;;  %1336 = vrot.lane.b32.xlu1 %v1306_v30, %s2485_s21  ;;  %v1331_v31 = vcombine.high %v1507_v29, %v1507_v29  ;;  %v1324_v32 = vmul.f32 %v1507_v29, %v1321_v12  ;;  %v1508_v33 = vld [vmem:[#allocation3 + $0x8] sm:$0xf]  ;;  %v1325_v36 = vmul.f32 %v1320_v18, %v1306_v30  ;;  %v2391_v30 = vld [vmem:[%s2878_s5 + $0x8] sm:$0xf] }
 0x3a8   : > { %v1527_v37 = vmul.f32 %v1522_v34, %v1508_v33  ;;  %v1526_v39 = vmul.f32 %v1523_v38, %v1507_v29  ;;  %v1622_v41 = vld [vmem:[#allocation3 + $0x8] sm:$0xf]  ;;  %v1629_v42 = vmul.f32 %v1626_v40, %v1507_v29 }
 0x3a9   : > { %v1630_v44 = vmul.f32 %v1625_v35, %v1622_v41  ;;  %v1420_v49 = vcombine.high %v1324_v32, %v1324_v32  ;;  %v2399_v35 = vld [vmem:[%s2878_s5 + $0x10] sm:$0xf]  ;;  %v2407_v40 = vld [vmem:[%s2878_s5 + $0x18] sm:$0xf]  ;;  %v2411_v41 = vld [vmem:[%s2878_s5 + $0x1c] sm:$0xf] }
 0x3aa   : > { %v1635_v52 = vcombine.high %v1629_v42, %v1629_v42  ;;  %v1532_v54 = vcombine.high %v1526_v39, %v1526_v39 }
 0x3ab   : > { %1334 = vrot.lane.b32.xlu0 %v1331_v31, %s2485_s21  ;;  %1421 = vrot.lane.b32.xlu1 %v1324_v32, %s2484_s20 }
 0x3af   : > { %1425 = vrot.lane.b32.xlu0 %v1325_v36, %s2484_s20  ;;  %1537 = vrot.lane.b32.xlu1 %v1527_v37, %s2483_s19  ;;  %v2403_v36 = vld [vmem:[%s2878_s5 + $0x14] sm:$0xf] }
 0x3b3   : > { %1533 = vrot.lane.b32.xlu0 %v1526_v39, %s2483_s19  ;;  %1636 = vrot.lane.b32.xlu1 %v1629_v42, %s2482_s18 }
 0x3b7   : > { %1640 = vrot.lane.b32.xlu0 %v1630_v44, %s2482_s18  ;;  %1927 = vrot.lane.b32.xlu1 %v1920_v45, %s2481_s17  ;;  %v2415_v45 = vld [vmem:[%s2878_s5 + $0x20] sm:$0xf] }
 0x3bb   : > { %1824 = vrot.lane.b32.xlu0 %v1817_v48, %s2480_s16  ;;  %1423 = vrot.lane.b32.xlu1 %v1420_v49, %s2484_s20 }
 0x3bf   : > { %2024 = vrot.lane.b32.xlu0 %v2761_v51, %s2486_s22  ;;  %1638 = vrot.lane.b32.xlu1 %v1635_v52, %s2482_s18 }
 0x3c3   : > { %1535 = vrot.lane.b32.xlu0 %v1532_v54, %s2483_s19  ;;  %1929 = vrot.lane.b32.xlu1 %v1926_v56, %s2481_s17 }
 0x3c7   : > { %1826 = vrot.lane.b32.xlu0 %v1823_v57, %s2480_s16  ;;  %2127 = vrot.lane.b32.xlu1 %v2124_v58, %s2479_s15 }
 0x3cb   : > { %2022 = vrot.lane.b32.xlu0 %v2737_v28, %s2486_s22  ;;  %2125 = vrot.lane.b32.xlu1 %v2118_v55, %s2479_s15 }
 0x3cf   : > { %2129 = vrot.lane.b32.xlu0 %v2119_v60, %s2479_s15 }
 0x40c   : > { %v1829_v61 = vpop.permute.xlu1 %1828 }
 0x410   : > { %v1932_v62 = vpop.permute.xlu0 %1931  ;;  %v2027_v5 = vpop.permute.xlu1 %2026 }
 0x419   : > { %v1333_v63 = vpop.permute.xlu0 %1332  ;;  %v1337_v6 = vpop.permute.xlu1 %1336 }
 0x41d   : > { %v1335_v0 = vpop.permute.xlu0 %1334  ;;  %v1422_v4 = vpop.permute.xlu1 %1421 }
 0x41e   : > { %v1338_v2 = vsel %vm344_vm4, %v1333_v63, %v1335_v0  ;;  %v1339_v3 = vsel %vm344_vm4, %v1335_v0, %v1337_v6 }
 0x41f   : > { %2384 = vmatprep.subr.msk.mxu1 %vm351_vm5, %v1339_v3 }
 0x420   : > { %2385 = vmatpush1.msk.msra.mxu1 %vm351_vm5, %v1338_v2 }
 0x421   : > { %v1426_v8 = vpop.permute.xlu0 %1425  ;;  %2386 = vmatmul.mubr.msk.f32.vlgmr.msra.gmra.mxu1 %vm347_vm7, %v2383_v7  ;;  %v1538_v9 = vpop.permute.xlu1 %1537 }
 0x422   : > { %1612 = vmatprep.mubr.f32.mxu1 %v2478_v1 }
 0x425   : > { %v1534_v10 = vpop.permute.xlu0 %1533  ;;  %v1637_v11 = vpop.permute.xlu1 %1636 }
 0x429   : > { %v1641_v13 = vpop.permute.xlu0 %1640  ;;  %v1928_v14 = vpop.permute.xlu1 %1927 }
 0x42d   : > { %v1825_v15 = vpop.permute.xlu0 %1824  ;;  %v1424_v16 = vpop.permute.xlu1 %1423 }
 0x42e   : > { %v1427_v17 = vsel %vm436_vm8, %v1422_v4, %v1424_v16  ;;  %v1428_v19 = vsel %vm436_vm8, %v1424_v16, %v1426_v8 }
 0x42f   : > { %2387 = vmatprep.subr.msk.mxu0 %vm351_vm5, %v1428_v19 }
 0x430   : > { %2388 = vmatpush1.msk.msra.mxu0 %vm351_vm5, %v1427_v17 }
 0x431   : > { %v2025_v21 = vpop.permute.xlu0 %2024  ;;  %v1639_v22 = vpop.permute.xlu1 %1638  ;;  %2389 = vmatmul.mubr.msk.f32.vlgmr.msra.gmra.mxu0 %vm347_vm7, %v1326_v20 }
 0x432   : > { %v1642_v23 = vsel %vm656_vm3, %v1637_v11, %v1639_v22  ;;  %v1643_v24 = vsel %vm656_vm3, %v1639_v22, %v1641_v13  ;;  %1715 = vmatprep.mubr.f32.mxu0 %v2478_v1  ;;  %v2029_v37 = vsel %vm1043_vm9, %v2025_v21, %v2027_v5 }
 0x433   : > { %2396 = vmatprep.subr.msk.mxu0 %vm351_vm5, %v1643_v24 }
 0x434   : > { %2397 = vmatpush1.msk.msra.mxu0 %vm351_vm5, %v1642_v23 }
 0x435   : > { %v1536_v26 = vpop.permute.xlu0 %1535  ;;  %v1930_v29 = vpop.permute.xlu1 %1929  ;;  %2398 = vmatmul.mubr.msk.f32.vlgmr.msra.gmra.mxu0 %vm347_vm7, %v2395_v25 }
 0x436   : > { %v1539_v27 = vsel %vm551_vm6, %v1534_v10, %v1536_v26  ;;  %v1540_v18 = vsel %vm551_vm6, %v1536_v26, %v1538_v9  ;;  %1903 = vmatprep.mubr.f32.mxu0 %v2478_v1  ;;  %v1934_v31 = vsel %vm534_vm1, %v1930_v29, %v1932_v62 }
 0x437   : > { %2392 = vmatprep.subr.msk.mxu1 %vm351_vm5, %v1540_v18 }
 0x438   : > { %2393 = vmatpush1.msk.msra.mxu1 %vm351_vm5, %v1539_v27 }
 0x439   : > { %v1827_v12 = vpop.permute.xlu0 %1826  ;;  %2394 = vmatmul.mubr.msk.f32.vlgmr.msra.gmra.mxu1 %vm347_vm7, %v2391_v30  ;;  %2400 = vmatprep.subr.msk.mxu1 %vm351_vm5, %v2761_v51  ;;  %v2128_v34 = vpop.permute.xlu1 %2127 }
 0x43a   : > { %v1830_v32 = vsel %vm639_vm2, %v1825_v15, %v1827_v12  ;;  %v1831_v33 = vsel %vm639_vm2, %v1827_v12, %v1829_v61  ;;  %2401 = vmatpush1.msk.msra.mxu1 %vm351_vm5, %v2737_v28  ;;  %1800 = vmatprep.mubr.f32.mxu1 %v2478_v1  ;;  %v1933_v28 = vsel %vm534_vm1, %v1928_v14, %v1930_v29 }
 0x43b   : > { %2404 = vmatprep.subr.msk.mxu0 %vm351_vm5, %v1831_v33  ;;  %2408 = vmatprep.subr.msk.mxu1 %vm351_vm5, %v1934_v31 }
 0x43c   : > { %2405 = vmatpush1.msk.msra.mxu0 %vm351_vm5, %v1830_v32 }
 0x43d   : > { %v2023_v38 = vpop.permute.xlu0 %2022  ;;  %2402 = vmatmul.mubr.msk.f32.vlgmr.msra.gmra.mxu1 %vm347_vm7, %v2399_v35  ;;  %2412 = vmatprep.subr.msk.mxu0 %vm351_vm5, %v2029_v37  ;;  %v2126_v42 = vpop.permute.xlu1 %2125 }
 0x43e   : > { %v2028_v39 = vsel %vm1043_vm9, %v2023_v38, %v2025_v21  ;;  %2409 = vmatpush1.msk.msra.mxu1 %vm351_vm5, %v1933_v28  ;;  %2406 = vmatmul.mubr.msk.f32.vlgmr.msra.gmra.mxu0 %vm347_vm7, %v2403_v36  ;;  %v2131_v46 = vsel %vm326_vm0, %v2126_v42, %v2128_v34 }
 0x43f   : > { %2413 = vmatpush1.msk.msra.mxu0 %vm351_vm5, %v2028_v39  ;;  %2006 = vmatprep.mubr.f32.mxu1 %v2478_v1 }
 0x440   : > { %2101 = vmatprep.mubr.f32.mxu0 %v2478_v1 }
 0x441   : > { %v2130_v43 = vpop.permute.xlu0 %2129  ;;  %2410 = vmatmul.mubr.msk.f32.vlgmr.msra.gmra.mxu1 %vm347_vm7, %v2407_v40 }
 0x442   : > { %v2132_v44 = vsel %vm326_vm0, %v2128_v34, %v2130_v43  ;;  %2414 = vmatmul.mubr.msk.f32.vlgmr.msra.gmra.mxu0 %vm347_vm7, %v2411_v41  ;;  %2204 = vmatprep.mubr.f32.mxu1 %v2478_v1  ;;  %v2251_v41 = vld [vmem:[%s2879_s6] sm:$0xf] }
 0x443   : > { %2416 = vmatprep.subr.msk.mxu1 %vm351_vm5, %v2132_v44 }
 0x444   : > { %2417 = vmatpush1.msk.msra.mxu1 %vm351_vm5, %v2131_v46 }
 0x445   : > { %2418 = vmatmul.mubr.msk.f32.vlgmr.msra.gmra.mxu1 %vm347_vm7, %v2415_v45  ;;  %v2254_v45 = vld [vmem:[%s2880_s7] sm:$0xf] }
 0x4e1   : > { %v1413_v48 = vpop.f32.mrf.mxu1 }
 0x4e3   : > { %v1415_v51 = vpop.f32.mrf.mxu1 }
 0x4f1   : > { %v1502_v47 = vpop.f32.mrf.mxu0 }
 0x4f2   : > { %v1503_v52 = vadd.f32 %v1502_v47, %v1413_v48 }
 0x4f3   : > { %v1504_v49 = vpop.f32.mrf.mxu0 }
 0x4f4   : > { %v1505_v1 = vadd.f32 %v1504_v49, %v1415_v51 }
 0x4f5   : > { %v1717_v50 = vpop.f32.mrf.mxu0 }
 0x4f7   : > { %v1719_v55 = vpop.f32.mrf.mxu0 }
 0x4f9   : > { %v1614_v53 = vpop.f32.mrf.mxu1 }
 0x4fa   : > { %v1619_v54 = vadd.f32 %v1614_v53, %v1503_v52 }
 0x4fb   : > { %v1616_v56 = vpop.f32.mrf.mxu1 }
 0x4fc   : > { %v1620_v57 = vadd.f32 %v1616_v56, %v1505_v1  ;;  %v1722_v58 = vadd.f32 %v1717_v50, %v1619_v54  ;;  %v2468_v54 = vld [vmem:[#allocation2 + $0x4] sm:$0xff] }
 0x4fd   : > { %v1802_v59 = vpop.f32.mrf.mxu1 }
 0x4fe   : > { %v1723_v60 = vadd.f32 %v1719_v55, %v1620_v57  ;;  %v1807_v61 = vadd.f32 %v1802_v59, %v1722_v58  ;;  %v1905_v62 = vpop.f32.mrf.mxu0 }
 0x4ff   : > { %v1804_v5 = vpop.f32.mrf.mxu1 }
 0x500   : > { %v1808_v63 = vadd.f32 %v1804_v5, %v1723_v60  ;;  %v1910_v6 = vadd.f32 %v1905_v62, %v1807_v61  ;;  %v1907_v0 = vpop.f32.mrf.mxu0 }
 0x501   : > { %v2008_v2 = vpop.f32.mrf.mxu1 }
 0x502   : > { %v1911_v3 = vadd.f32 %v1907_v0, %v1808_v63  ;;  %v2013_v4 = vadd.f32 %v2008_v2, %v1910_v6  ;;  %v2103_v7 = vpop.f32.mrf.mxu0 }
 0x503   : > { %v2010_v8 = vpop.f32.mrf.mxu1 }
 0x504   : > { %v2014_v9 = vadd.f32 %v2010_v8, %v1911_v3  ;;  %v2108_v10 = vadd.f32 %v2103_v7, %v2013_v4  ;;  %v2105_v11 = vpop.f32.mrf.mxu0 }
 0x505   : > { %v2206_v13 = vpop.f32.mrf.mxu1 }
 0x506   : > { %v2109_v14 = vadd.f32 %v2105_v11, %v2014_v9  ;;  %v2211_v15 = vadd.f32 %v2206_v13, %v2108_v10 }
 0x507   : > { %v2208_v16 = vpop.f32.mrf.mxu1 }
 0x508   : > { %v2212_v17 = vadd.f32 %v2208_v16, %v2109_v14  ;;  %v2225_v19 = vmul.f32 %v2211_v15, %v2211_v15  ;;  %v2213_v20 = vsel %vm351_vm5, %v2211_v15, 0.0 }
 0x50a   : > { %v2214_v21 = vsel %vm351_vm5, %v2212_v17, 0.0  ;;  %v2226_v22 = vmul.f32 %v2212_v17, %v2212_v17  ;;  %v2227_v24 = vsel %vm351_vm5, %v2225_v19, 0.0 }
 0x50b   : > { %v2215_v23 = vadd.f32 %v2214_v21, %v2213_v20 }
 0x50c   : > { %v2228_v25 = vsel %vm351_vm5, %v2226_v22, 0.0 }
 0x50d   : > { %2216 = vadd.xlane.f32.xlu0 %v2215_v23  ;;  %v2229_v26 = vadd.f32 %v2228_v25, %v2227_v24 }
 0x50f   : > { %2230 = vadd.xlane.f32.xlu1 %v2229_v26 }
 0x596   : > { %v2217_v27 = vpop.xlane.xlu0 %2216 }
 0x597   : > { %v2218_v18 = vrot.slane %v2217_v27, 4 }
 0x598   : > { %v2231_v29 = vpop.xlane.xlu1 %2230 }
 0x599   : > { %v2219_v30 = vadd.f32 %v2218_v18, %v2217_v27  ;;  %v2232_v12 = vrot.slane %v2231_v29, 4 }
 0x59b   : > { %v2220_v31 = vrot.slane %v2219_v30, 2  ;;  %v2233_v32 = vadd.f32 %v2232_v12, %v2231_v29 }
 0x59d   : > { %v2234_v33 = vrot.slane %v2233_v32, 2  ;;  %v2221_v34 = vadd.f32 %v2220_v31, %v2219_v30 }
 0x59f   : > { %v2222_v35 = vrot.slane %v2221_v34, 1  ;;  %v2235_v36 = vadd.f32 %v2234_v33, %v2233_v32 }
 0x5a1   : > { %v2223_v37 = vadd.f32 %v2222_v35, %v2221_v34  ;;  %v2236_v28 = vrot.slane %v2235_v36, 1 }
 0x5a3   : > { %2429 = vpush %v2223_v37  ;;  %v2237_v38 = vadd.f32 %v2236_v28, %v2235_v36 }
 0x5a5   : > { %2431 = vpush %v2237_v38 }
 0x5d4   : > { %s2430_s14 = spop %2429 }
 0x5d5   : > { %s2241_s23 = smul.f32 0.0009765625, %s2430_s14 }
 0x5d6   : > { %s2432_s11 = spop %2431 }
 0x5d7   : > { %s2245_s16 = smul.f32 %s2241_s23, %s2241_s23  ;;  %v2255_v44 = vstv %s2241_s23 }
 0x5d8   : > { %s2244_s15 = smul.f32 0.0009765625, %s2432_s11 }
 0x5da   : > { %s2246_s17 = ssub.f32 %s2244_s15, %s2245_s16 }
 0x5dc   : > { %s2247_s18 = sadd.f32 1e-05, %s2246_s17 }
 0x5de   : > { %v2248_v39 = vstv %s2247_s18 }
 0x5df   : > { %2464 = vrsqrt.f32 %v2248_v39 }
 0x5ec   : > { %v2465_v40 = vpop.eup %2464 }
 0x5ed   : > { %2433 = vpush %v2465_v40 }
 0x61e   : > { %s2434_s21 = spop %2433 }
 0x61f   : > { %v2252_v42 = vstv %s2434_s21 }
 0x620   : > { %v2253_v43 = vmul.f32 %v2252_v42, %v2251_v41 }
 0x622   : > { %v2256_v46 = vmul.f32 %v2255_v44, %v2253_v43  ;;  %2260 = vperm.xlu0 %2453, %v2253_v43  }
 0x624   : > { %v2257_v47 = vsub.f32 %v2254_v45, %v2256_v46 }
 0x626   : > { %2267 = vperm.xlu1 %2454, %v2257_v47  }
 0x69d   : > { %v2261_v48 = vpop.permute.xlu0 %2260 }
 0x69e   : > { %v2263_v49 = vmul.f32 %v2261_v48, %v2211_v15  ;;  %v2264_v50 = vmul.f32 %v2261_v48, %v2212_v17 }
 0x6a1   : > { %v2268_v51 = vpop.permute.xlu1 %2267 }
 0x6a2   : > { %v2270_v52 = vadd.f32 %v2268_v51, %v2263_v49  ;;  %v2271_v53 = vadd.f32 %v2268_v51, %v2264_v50 }
 0x6a4   : > { %v2274_v1 = vcombine.low %v2270_v52, %v2271_v53 }
 0x6a6   : > { %v2276_v55 = vadd.f32 %v2468_v54, %v2274_v1 }
 0x6a8   : > { %v2278_v56 = vmul.f32 0.70710677, %v2276_v55  ;;  %v2277_v58 = vmul.f32 0.5, %v2276_v55 }
 0x6aa   : > { %2466 = verf.f32 %v2278_v56 }
 0x6b7   : > { %v2467_v57 = vpop.eup %2466 }
 0x6b8   : > { %v2280_v59 = vadd.f32 1.0, %v2467_v57 }
 0x6ba   : > { %v2281_v60 = vmul.f32 %v2280_v59, %v2277_v58 }
 0x6bc   : > { %2282 = vst [vmem:[%s305_s29] sm:$0xff] %v2281_v60 }
 0x6bd PF: > { %s18_s27 = sadd.s32 1, %s2476_s27  }
 0x6be   : > { %p15_p4 = scmp.ge.s32.totalorder %s18_s27, 4  }
 0x6c0   :  { %17 = sbr.rel (!%p15_p4) target bundleno = 1 (0x1), region = 99 }

</bundles_post_ra>
